<compile_context>
chip_gen: v7x
topology: tpu7x:2x2x1
jax: 0.10.0
libtpu: 0.0.40
codegen_flags: <defaults>
</compile_context>

<pallas_src>
import functools

import jax
import jax.numpy as jnp
from jax import lax
from jax.experimental import pallas as pl
from jax.experimental.pallas import tpu as pltpu

# ----------------------------- model config --------------------------------
B = 2
T = 8
D_MODEL = 64
D_FF = 128
N_HEADS = 4
D_HEAD = D_MODEL // N_HEADS
ROPE_DIM = D_HEAD          # rope_dim == head_dim
CONV_K = 7                 # conv_kernel_size, (K-1) % 2 == 0
FC_FACTOR = 0.5
RMS_EPS = 1e-5
BN_EPS = 1e-5
ROPE_BASE = 10000.0

# ------------------------- packed-slab index tables -------------------------
# (D, D) weight slab
I_WQ, I_WQR, I_WK, I_WKR, I_WV, I_WO, I_PW1A, I_PW1G, I_PW2 = range(9)
N_WDD = 9
# (D, D_FF) weight slab
I_F1_W1, I_F1_WV, I_F2_W1, I_F2_WV = range(4)
N_WDFF = 4
# (D_FF, D) weight slab
I_F1_W2, I_F2_W2 = range(2)
N_WFFD = 2
# (1, D) vector slab rows
(V_F1_RMS, V_AT_RMS, V_CV_RMS, V_F2_RMS, V_OUT_RMS,
 V_F1_B2, V_F2_B2,
 V_BQ, V_BQR, V_BK, V_BKR, V_BV, V_BO,
 V_PW1_BA, V_PW1_BG, V_BN_SCALE, V_BN_SHIFT, V_PW2_B,
 V_DW0) = range(19)        # depthwise taps occupy V_DW0 .. V_DW0 + CONV_K - 1
N_VEC_D = V_DW0 + CONV_K
# (1, D_FF) vector slab rows
VF_F1_B1, VF_F1_BV, VF_F2_B1, VF_F2_BV = range(4)
N_VEC_FF = 4


# ----------------------------- shared math ---------------------------------
def _rms_norm(x, w, eps=RMS_EPS):
    ms = jnp.mean(x * x, axis=-1, keepdims=True)
    return x * lax.rsqrt(ms + eps) * w


def _silu(x):
    return x * jax.nn.sigmoid(x)


def _rope_half_tables(seq_len, dim, offset=0, base=ROPE_BASE):
    """cos/sin over the half-dim angle table, shape (seq, dim//2)."""
    inv_freq = 1.0 / (base ** (jnp.arange(0, dim, 2, dtype=jnp.float32) / dim))
    pos = jnp.arange(offset, offset + seq_len, dtype=jnp.float32)
    ang = pos[:, None] * inv_freq[None, :]
    return jnp.cos(ang), jnp.sin(ang)


def _dot(a, b):
    return jnp.dot(a, b, preferred_element_type=jnp.float32)


def _dot_nt(a, b):
    # a @ b.T without materializing the transpose (contract last dims on the MXU).
    return lax.dot_general(a, b, (((1,), (1,)), ((), ())),
                           preferred_element_type=jnp.float32)


# --------------------------- fused layer kernel ------------------------------
def _conformer_layer_kernel(
        act_ref,      # (4*B*T, D): [x ; cos ; sin ; pos] stacked along sublanes
        wdd_ref,      # (9, D, D):  wq, wq_rot, wk, wk_rot, wv, wo, pw1_a, pw1_g, pw2
        wdff_ref,     # (4, D, D_FF): f1_w1, f1_wv, f2_w1, f2_wv
        wffd_ref,     # (2, D_FF, D): f1_w2, f2_w2
        vecd_ref,     # (N_VEC_D, D): rms weights, biases, bn scale/shift, dw taps
        vecff_ref,    # (N_VEC_FF, D_FF): FFN hidden biases
        o_ref,        # (B*T, D) output
        ctx_ref,      # (B*T, D) VMEM scratch for per-head attention context
        *, batch, seq, n_heads, d_head, kernel_size, fc_factor):
    bt = batch * seq

    vecd = vecd_ref[...]          # (N_VEC_D, D)  small, keep as a value
    vecff = vecff_ref[...]        # (N_VEC_FF, D_FF)

    def vd(i):                    # (1, D) row of the vector slab
        return vecd[i:i + 1, :]

    def vff(i):                   # (1, D_FF) row of the FF vector slab
        return vecff[i:i + 1, :]

    x = act_ref[0 * bt:1 * bt, :]         # (B*T, D)
    cos = act_ref[1 * bt:2 * bt, :]       # full-width RoPE cos, tiled over heads/batch
    sin = act_ref[2 * bt:3 * bt, :]
    pos = act_ref[3 * bt:4 * bt, :]       # position-in-sequence per row (f32)

    def ffn(r, rms_w, w1, b1, wv, bv, w2, b2):
        xn = _rms_norm(r, rms_w)
        gate = _silu(_dot(xn, w1) + b1)
        val = _dot(xn, wv) + bv
        return r + fc_factor * (_dot(gate * val, w2) + b2)

    r = x                                                    # (B*T, D) residual

    # ---------------- Macaron FFN #1 (0.5 * FFN) ----------------
    r = ffn(r, vd(V_F1_RMS), wdff_ref[I_F1_W1], vff(VF_F1_B1),
            wdff_ref[I_F1_WV], vff(VF_F1_BV), wffd_ref[I_F1_W2], vd(V_F1_B2))

    # ---------------- RoPE multi-head self-attention ----------------
    xn = _rms_norm(r, vd(V_AT_RMS))
    # Full-width projections (5 MXU dots); rotate-half is baked into wq_rot/wk_rot,
    # so q_roped = q*cos + q_rot*sin with full-width cos/sin (same for all heads).
    q = _dot(xn, wdd_ref[I_WQ]) + vd(V_BQ)
    qr = _dot(xn, wdd_ref[I_WQR]) + vd(V_BQR)
    k = _dot(xn, wdd_ref[I_WK]) + vd(V_BK)
    kr = _dot(xn, wdd_ref[I_WKR]) + vd(V_BKR)
    v = _dot(xn, wdd_ref[I_WV]) + vd(V_BV)
    qro = q * cos + qr * sin
    kro = k * cos + kr * sin
    scale = 1.0 / (d_head ** 0.5)                            # 1 / s_d_k
    # Per-(batch, head) score / ctx dots stay tiny; static unroll (B*H = 8 small
    # bodies) with each iteration's temporaries dying at the ctx store below.
    for b in range(batch):
        rs = slice(b * seq, (b + 1) * seq)                   # aligned sublane slice
        qb, kb, vb = qro[rs], kro[rs], v[rs]
        for h in range(n_heads):
            cs = slice(h * d_head, (h + 1) * d_head)
            s = _dot_nt(qb[:, cs], kb[:, cs]) * scale        # (T, T)
            s = s - jnp.max(s, axis=-1, keepdims=True)
            e = jnp.exp(s)
            p = e * pl.reciprocal(jnp.sum(e, axis=-1, keepdims=True), approx=True)
            ctx_ref[rs, cs] = _dot(p, vb[:, cs])             # (T, d_head) ctx slice
    # Single full-width output projection through W_o.
    r = r + _dot(ctx_ref[...], wdd_ref[I_WO]) + vd(V_BO)

    # ---------------- Conformer convolution module ----------------
    xn = _rms_norm(r, vd(V_CV_RMS))
    # pointwise_conv1 (1x1 conv == matmul), GLU with the weight pre-split in wrapper
    a = _dot(xn, wdd_ref[I_PW1A]) + vd(V_PW1_BA)             # value half
    g = _dot(xn, wdd_ref[I_PW1G]) + vd(V_PW1_BG)             # gate half
    glu = a * jax.nn.sigmoid(g)                              # (B*T, D)
    # Depthwise causal conv: out[t] = sum_j dw[K-1-j] * glu[t-j], glu[<0] = 0.
    # pltpu.roll along sublanes + causal mask (pos >= j) replaces unaligned slices;
    # the mask also kills the roll's wraparound across the batch boundary.
    acc = glu * vd(V_DW0 + kernel_size - 1)                  # j = 0 tap (no mask)
    for j in range(1, kernel_size):
        rolled = pltpu.roll(glu, shift=j, axis=0)            # XLU, rolled[t]=glu[t-j]
        acc = acc + jnp.where(pos >= float(j), rolled, 0.0) * \
            vd(V_DW0 + kernel_size - 1 - j)
    # eval-mode BatchNorm (+ depthwise bias) folded to one scale/shift (wrapper-side)
    bn = acc * vd(V_BN_SCALE) + vd(V_BN_SHIFT)
    r = r + _dot(_silu(bn), wdd_ref[I_PW2]) + vd(V_PW2_B)

    # ---------------- Macaron FFN #2 (0.5 * FFN) ----------------
    r = ffn(r, vd(V_F2_RMS), wdff_ref[I_F2_W1], vff(VF_F2_B1),
            wdff_ref[I_F2_WV], vff(VF_F2_BV), wffd_ref[I_F2_W2], vd(V_F2_B2))

    # ---------------- output RMSNorm ----------------
    o_ref[...] = _rms_norm(r, vd(V_OUT_RMS))


# ------------------------------ wrapper --------------------------------------
@jax.jit
def conformer_layer_forward(x, params):
    b, t, d = x.shape
    nh, dk = N_HEADS, D_HEAD
    half = dk // 2
    bt = b * t

    # --- RoPE tables: full-width over heads, tiled over batch (offset 0) ---
    cos_a, sin_a = _rope_half_tables(t, dk)                  # (t, dk//2)
    cos_full = jnp.tile(jnp.concatenate([cos_a, cos_a], axis=-1), (1, nh))  # (t, d)
    sin_full = jnp.tile(jnp.concatenate([sin_a, sin_a], axis=-1), (1, nh))
    cos_bt = jnp.tile(cos_full, (b, 1))                      # (b*t, d)
    sin_bt = jnp.tile(sin_full, (b, 1))
    pos_bt = jnp.tile(jnp.arange(t, dtype=jnp.float32)[:, None], (b, d))   # (b*t, d)

    # --- attention weights: pre-permuted/negated "rotate-half" copies ---
    pa = params["attn"]

    def rot(w, bias):
        w_h = w.reshape(d, nh, dk)
        b_h = bias.reshape(1, nh, dk)
        w_r = jnp.concatenate([-w_h[..., half:], w_h[..., :half]], axis=-1).reshape(d, d)
        b_r = jnp.concatenate([-b_h[..., half:], b_h[..., :half]], axis=-1).reshape(1, d)
        return w_r, b_r

    wq_r, bq_r = rot(pa["wq"], pa["bq"])
    wk_r, bk_r = rot(pa["wk"], pa["bk"])

    # --- conv module: GLU split + eval-mode BN / depthwise-bias folding ---
    pc = params["conv"]
    pw1_wa, pw1_wg = pc["pw1_w"][:, :d], pc["pw1_w"][:, d:]
    pw1_ba, pw1_bg = pc["pw1_b"][:, :d], pc["pw1_b"][:, d:]
    bn_scale = pc["bn_g"] * lax.rsqrt(pc["bn_v"] + BN_EPS)
    bn_shift = (pc["dw_b"] - pc["bn_m"]) * bn_scale + pc["bn_b"]

    f1, f2 = params["ff1"], params["ff2"]

    # --- pack everything into 6 lane/sublane-dense slabs (6 entry DMAs) ---
    # TODO(synk): at realistic sizes, cast the weight slabs to bf16 (f32 accumulate)
    #             on v6e/v7x; keep elementwise math f32 (v5e has no bf16 VPU/EUP).
    act = jnp.concatenate([x.reshape(bt, d), cos_bt, sin_bt, pos_bt], axis=0)
    w_dd = jnp.stack([pa["wq"], wq_r, pa["wk"], wk_r, pa["wv"], pa["wo"],
                      pw1_wa, pw1_wg, pc["pw2_w"]], axis=0)              # (9, d, d)
    w_dff = jnp.stack([f1["w1"], f1["wv"], f2["w1"], f2["wv"]], axis=0)  # (4, d, dff)
    w_ffd = jnp.stack([f1["w2"], f2["w2"]], axis=0)                      # (2, dff, d)
    vec_d = jnp.concatenate([
        f1["rms_w"], pa["rms_w"], pc["rms_w"], f2["rms_w"], params["norm_out_w"],
        f1["b2"], f2["b2"],
        pa["bq"], bq_r, pa["bk"], bk_r, pa["bv"], pa["bo"],
        pw1_ba, pw1_bg, bn_scale, bn_shift, pc["pw2_b"],
        pc["dw_w"],
    ], axis=0)                                                           # (N_VEC_D, d)
    vec_ff = jnp.concatenate([f1["b1"], f1["bv"], f2["b1"], f2["bv"]], axis=0)

    kernel = functools.partial(
        _conformer_layer_kernel, batch=b, seq=t, n_heads=nh,
        d_head=dk, kernel_size=CONV_K, fc_factor=FC_FACTOR)

    vmem = pl.BlockSpec(memory_space=pltpu.MemorySpace.VMEM)
    # TODO(synk): at scale, use grid=(B,) + dimension_semantics=("parallel",) for
    #             v7x's two TensorCores, T-tiled BlockSpecs against the 64 MiB
    #             VMEM budget, and flash-style online softmax over KV tiles.
    out = pl.pallas_call(
        kernel,
        out_shape=jax.ShapeDtypeStruct((bt, d), jnp.float32),
        in_specs=[vmem] * 6,                  # whole problem, single invocation
        out_specs=vmem,
        scratch_shapes=[pltpu.VMEM((bt, d), jnp.float32)],   # attention ctx scratch
    )(act, w_dd, w_dff, w_ffd, vec_d, vec_ff)
    return out.reshape(b, t, d)


# -------------------------- parameter construction ---------------------------
def init_params(key):
    keys = iter(jax.random.split(key, 64))

    def normal(shape, scale=0.02):
        return scale * jax.random.normal(next(keys), shape, dtype=jnp.float32)

    def near_one(shape):
        return 1.0 + 0.1 * jax.random.normal(next(keys), shape, dtype=jnp.float32)

    def ffn_params():
        return dict(
            rms_w=near_one((1, D_MODEL)),
            w1=normal((D_MODEL, D_FF)), b1=normal((1, D_FF)),
            wv=normal((D_MODEL, D_FF)), bv=normal((1, D_FF)),
            w2=normal((D_FF, D_MODEL)), b2=normal((1, D_MODEL)),
        )

    params = dict(
        ff1=ffn_params(),
        ff2=ffn_params(),
        attn=dict(
            rms_w=near_one((1, D_MODEL)),
            wq=normal((D_MODEL, D_MODEL)), bq=normal((1, D_MODEL)),
            wk=normal((D_MODEL, D_MODEL)), bk=normal((1, D_MODEL)),
            wv=normal((D_MODEL, D_MODEL)), bv=normal((1, D_MODEL)),
            wo=normal((D_MODEL, D_MODEL)), bo=normal((1, D_MODEL)),
        ),
        conv=dict(
            rms_w=near_one((1, D_MODEL)),
            pw1_w=normal((D_MODEL, 2 * D_MODEL)), pw1_b=normal((1, 2 * D_MODEL)),
            dw_w=normal((CONV_K, D_MODEL)),       dw_b=normal((1, D_MODEL)),
            bn_g=near_one((1, D_MODEL)),
            bn_b=0.1 * jax.random.normal(next(keys), (1, D_MODEL), jnp.float32),
            bn_m=0.05 * jax.random.normal(next(keys), (1, D_MODEL), jnp.float32),
            bn_v=1.0 + 0.1 * jnp.abs(
                jax.random.normal(next(keys), (1, D_MODEL), jnp.float32)),
            pw2_w=normal((D_MODEL, D_MODEL)),     pw2_b=normal((1, D_MODEL)),
        ),
        norm_out_w=near_one((1, D_MODEL)),
    )
    return params


# --------------------------- pure-JAX reference -------------------------------
def ref_forward(x, params):
    def ffn(xr, p):
        xn = _rms_norm(xr, p["rms_w"])
        gate = _silu(xn @ p["w1"] + p["b1"])
        val = xn @ p["wv"] + p["bv"]
        return xr + FC_FACTOR * ((gate * val) @ p["w2"] + p["b2"])

    def rotate_half(z):
        half = z.shape[-1] // 2
        return jnp.concatenate([-z[..., half:], z[..., :half]], axis=-1)

    def attn(xr, p):
        b, t, d = xr.shape
        xn = _rms_norm(xr, p["rms_w"])
        q = (xn @ p["wq"] + p["bq"]).reshape(b, t, N_HEADS, D_HEAD)
        k = (xn @ p["wk"] + p["bk"]).reshape(b, t, N_HEADS, D_HEAD)
        v = (xn @ p["wv"] + p["bv"]).reshape(b, t, N_HEADS, D_HEAD)
        cos_a, sin_a = _rope_half_tables(t, D_HEAD)
        cos = jnp.concatenate([cos_a, cos_a], axis=-1)[None, :, None, :]
        sin = jnp.concatenate([sin_a, sin_a], axis=-1)[None, :, None, :]
        q = q * cos + rotate_half(q) * sin
        k = k * cos + rotate_half(k) * sin
        s = jnp.einsum("bthd,bshd->bhts", q, k) / (D_HEAD ** 0.5)
        p_attn = jax.nn.softmax(s, axis=-1)
        ctx = jnp.einsum("bhts,bshd->bthd", p_attn, v).reshape(b, t, d)
        return xr + ctx @ p["wo"] + p["bo"]

    def conv(xr, p):
        b, t, d = xr.shape
        xn = _rms_norm(xr, p["rms_w"])
        h = xn @ p["pw1_w"] + p["pw1_b"]
        glu = h[..., :d] * jax.nn.sigmoid(h[..., d:])
        gp = jnp.pad(glu, ((0, 0), (CONV_K - 1, 0), (0, 0)))
        acc = jnp.zeros_like(glu)
        for kk in range(CONV_K):
            acc = acc + gp[:, kk:kk + t, :] * p["dw_w"][kk]
        acc = acc + p["dw_b"]
        bn = (acc - p["bn_m"]) * lax.rsqrt(p["bn_v"] + BN_EPS) * p["bn_g"] + p["bn_b"]
        return xr + _silu(bn) @ p["pw2_w"] + p["pw2_b"]

    r = ffn(x, params["ff1"])
    r = attn(r, params["attn"])
    r = conv(r, params["conv"])
    r = ffn(r, params["ff2"])
    return _rms_norm(r, params["norm_out_w"])


# ----------------------------------- main ------------------------------------
if __name__ == "__main__":
    key = jax.random.PRNGKey(0)
    kx, kp = jax.random.split(key)
    x = jax.random.normal(kx, (B, T, D_MODEL), dtype=jnp.float32)
    params = init_params(kp)

    out = jax.block_until_ready(conformer_layer_forward(x, params))

    assert out.shape == (B, T, D_MODEL)
    assert bool(jnp.all(jnp.isfinite(out)))

    ref = ref_forward(x, params)
    max_err = float(jnp.max(jnp.abs(out - ref)))
    assert max_err < 5e-3, f"mismatch vs reference: max abs err = {max_err}"

    print("KERNEL_OK")
</pallas_src>

<mosaic_0001>
module attributes {stable_mosaic.version = 11 : i64} {
  func.func @_conformer_layer_kernel(%arg0: memref<64x64xf32, #tpu.memory_space<vmem>>, %arg1: memref<9x64x64xf32, #tpu.memory_space<vmem>>, %arg2: memref<4x64x128xf32, #tpu.memory_space<vmem>>, %arg3: memref<2x128x64xf32, #tpu.memory_space<vmem>>, %arg4: memref<25x64xf32, #tpu.memory_space<vmem>>, %arg5: memref<4x128xf32, #tpu.memory_space<vmem>>, %arg6: memref<16x64xf32, #tpu.memory_space<vmem>>, %arg7: memref<16x64xf32, #tpu.memory_space<vmem>>) attributes {dimension_semantics = [], scalar_prefetch = 0 : i64, scratch_operands = 1 : i64, tpu.core_type = #tpu.core_type<tc>} {
    %c0 = arith.constant 0 : index
    %c0_0 = arith.constant 0 : index
    %0 = vector.load %arg4[%c0, %c0_0] : memref<25x64xf32, #tpu.memory_space<vmem>>, vector<25x64xf32>
    %c0_1 = arith.constant 0 : index
    %c0_2 = arith.constant 0 : index
    %1 = vector.load %arg5[%c0_1, %c0_2] : memref<4x128xf32, #tpu.memory_space<vmem>>, vector<4x128xf32>
    %c0_3 = arith.constant 0 : index
    %c0_4 = arith.constant 0 : index
    %2 = vector.load %arg0[%c0_3, %c0_4] : memref<64x64xf32, #tpu.memory_space<vmem>>, vector<16x64xf32>
    %c16 = arith.constant 16 : index
    %c0_5 = arith.constant 0 : index
    %3 = vector.load %arg0[%c16, %c0_5] : memref<64x64xf32, #tpu.memory_space<vmem>>, vector<16x64xf32>
    %c32 = arith.constant 32 : index
    %c0_6 = arith.constant 0 : index
    %4 = vector.load %arg0[%c32, %c0_6] : memref<64x64xf32, #tpu.memory_space<vmem>>, vector<16x64xf32>
    %c48 = arith.constant 48 : index
    %c0_7 = arith.constant 0 : index
    %5 = vector.load %arg0[%c48, %c0_7] : memref<64x64xf32, #tpu.memory_space<vmem>>, vector<16x64xf32>
    %6 = vector.extract_strided_slice %0 {offsets = [0, 0], sizes = [1, 64], strides = [1, 1]} : vector<25x64xf32> to vector<1x64xf32>
    %c0_8 = arith.constant 0 : index
    %c0_9 = arith.constant 0 : index
    %c0_10 = arith.constant 0 : index
    %7 = vector.load %arg2[%c0_8, %c0_9, %c0_10] : memref<4x64x128xf32, #tpu.memory_space<vmem>>, vector<1x64x128xf32>
    %8 = vector.shape_cast %7 : vector<1x64x128xf32> to vector<64x128xf32>
    %9 = vector.extract_strided_slice %1 {offsets = [0, 0], sizes = [1, 128], strides = [1, 1]} : vector<4x128xf32> to vector<1x128xf32>
    %c1 = arith.constant 1 : index
    %c0_11 = arith.constant 0 : index
    %c0_12 = arith.constant 0 : index
    %10 = vector.load %arg2[%c1, %c0_11, %c0_12] : memref<4x64x128xf32, #tpu.memory_space<vmem>>, vector<1x64x128xf32>
    %11 = vector.shape_cast %10 : vector<1x64x128xf32> to vector<64x128xf32>
    %12 = vector.extract_strided_slice %1 {offsets = [1, 0], sizes = [1, 128], strides = [1, 1]} : vector<4x128xf32> to vector<1x128xf32>
    %c0_13 = arith.constant 0 : index
    %c0_14 = arith.constant 0 : index
    %c0_15 = arith.constant 0 : index
    %13 = vector.load %arg3[%c0_13, %c0_14, %c0_15] : memref<2x128x64xf32, #tpu.memory_space<vmem>>, vector<1x128x64xf32>
    %14 = vector.shape_cast %13 : vector<1x128x64xf32> to vector<128x64xf32>
    %15 = vector.extract_strided_slice %0 {offsets = [5, 0], sizes = [1, 64], strides = [1, 1]} : vector<25x64xf32> to vector<1x64xf32>
    %16 = arith.mulf %2, %2 : vector<16x64xf32>
    %cst = arith.constant dense<0.000000e+00> : vector<16xf32>
    %17 = vector.multi_reduction <add>, %16, %cst [1] : vector<16x64xf32> to vector<16xf32>
    %18 = vector.shape_cast %17 : vector<16xf32> to vector<16x1xf32>
    %cst_16 = arith.constant 6.400000e+01 : f32
    %19 = vector.broadcast %cst_16 : f32 to vector<16x1xf32>
    %20 = arith.divf %18, %19 : vector<16x1xf32>
    %cst_17 = arith.constant 9.99999974E-6 : f32
    %21 = vector.broadcast %cst_17 : f32 to vector<16x1xf32>
    %22 = arith.addf %20, %21 : vector<16x1xf32>
    %23 = math.rsqrt %22 : vector<16x1xf32>
    %24 = vector.broadcast %23 : vector<16x1xf32> to vector<16x64xf32>
    %25 = arith.mulf %2, %24 : vector<16x64xf32>
    %26 = vector.broadcast %6 : vector<1x64xf32> to vector<16x64xf32>
    %27 = arith.mulf %25, %26 : vector<16x64xf32>
    %cst_18 = arith.constant dense<0.000000e+00> : vector<16x128xf32>
    %28 = tpu.matmul %27, %8, %cst_18 {dimension_numbers = #tpu.dot_dimension_numbers<[1], [0], [0], [1], [0, 0, 1, 1], [], []>} : vector<16x64xf32>, vector<64x128xf32>, vector<16x128xf32> -> vector<16x128xf32>
    %29 = vector.broadcast %9 : vector<1x128xf32> to vector<16x128xf32>
    %30 = arith.addf %28, %29 : vector<16x128xf32>
    %31 = arith.negf %30 : vector<16x128xf32>
    %32 = math.exp %31 : vector<16x128xf32>
    %cst_19 = arith.constant 1.000000e+00 : f32
    %33 = vector.broadcast %cst_19 : f32 to vector<16x128xf32>
    %34 = arith.addf %33, %32 : vector<16x128xf32>
    %35 = arith.divf %33, %34 : vector<16x128xf32>
    %36 = arith.mulf %30, %35 : vector<16x128xf32>
    %cst_20 = arith.constant dense<0.000000e+00> : vector<16x128xf32>
    %37 = tpu.matmul %27, %11, %cst_20 {dimension_numbers = #tpu.dot_dimension_numbers<[1], [0], [0], [1], [0, 0, 1, 1], [], []>} : vector<16x64xf32>, vector<64x128xf32>, vector<16x128xf32> -> vector<16x128xf32>
    %38 = vector.broadcast %12 : vector<1x128xf32> to vector<16x128xf32>
    %39 = arith.addf %37, %38 : vector<16x128xf32>
    %40 = arith.mulf %36, %39 : vector<16x128xf32>
    %cst_21 = arith.constant dense<0.000000e+00> : vector<16x64xf32>
    %41 = tpu.matmul %40, %14, %cst_21 {dimension_numbers = #tpu.dot_dimension_numbers<[1], [0], [0], [1], [0, 0, 1, 1], [], []>} : vector<16x128xf32>, vector<128x64xf32>, vector<16x64xf32> -> vector<16x64xf32>
    %42 = vector.broadcast %15 : vector<1x64xf32> to vector<16x64xf32>
    %43 = arith.addf %41, %42 : vector<16x64xf32>
    %cst_22 = arith.constant 5.000000e-01 : f32
    %44 = vector.broadcast %cst_22 : f32 to vector<16x64xf32>
    %45 = arith.mulf %44, %43 : vector<16x64xf32>
    %46 = arith.addf %2, %45 : vector<16x64xf32>
    %47 = vector.extract_strided_slice %0 {offsets = [1, 0], sizes = [1, 64], strides = [1, 1]} : vector<25x64xf32> to vector<1x64xf32>
    %48 = arith.mulf %46, %46 : vector<16x64xf32>
    %cst_23 = arith.constant dense<0.000000e+00> : vector<16xf32>
    %49 = vector.multi_reduction <add>, %48, %cst_23 [1] : vector<16x64xf32> to vector<16xf32>
    %50 = vector.shape_cast %49 : vector<16xf32> to vector<16x1xf32>
    %cst_24 = arith.constant 6.400000e+01 : f32
    %51 = vector.broadcast %cst_24 : f32 to vector<16x1xf32>
    %52 = arith.divf %50, %51 : vector<16x1xf32>
    %cst_25 = arith.constant 9.99999974E-6 : f32
    %53 = vector.broadcast %cst_25 : f32 to vector<16x1xf32>
    %54 = arith.addf %52, %53 : vector<16x1xf32>
    %55 = math.rsqrt %54 : vector<16x1xf32>
    %56 = vector.broadcast %55 : vector<16x1xf32> to vector<16x64xf32>
    %57 = arith.mulf %46, %56 : vector<16x64xf32>
    %58 = vector.broadcast %47 : vector<1x64xf32> to vector<16x64xf32>
    %59 = arith.mulf %57, %58 : vector<16x64xf32>
    %c0_26 = arith.constant 0 : index
    %c0_27 = arith.constant 0 : index
    %c0_28 = arith.constant 0 : index
    %60 = vector.load %arg1[%c0_26, %c0_27, %c0_28] : memref<9x64x64xf32, #tpu.memory_space<vmem>>, vector<1x64x64xf32>
    %61 = vector.shape_cast %60 : vector<1x64x64xf32> to vector<64x64xf32>
    %cst_29 = arith.constant dense<0.000000e+00> : vector<16x64xf32>
    %62 = tpu.matmul %59, %61, %cst_29 {dimension_numbers = #tpu.dot_dimension_numbers<[1], [0], [0], [1], [0, 0, 1, 1], [], []>} : vector<16x64xf32>, vector<64x64xf32>, vector<16x64xf32> -> vector<16x64xf32>
    %63 = vector.extract_strided_slice %0 {offsets = [7, 0], sizes = [1, 64], strides = [1, 1]} : vector<25x64xf32> to vector<1x64xf32>
    %64 = vector.broadcast %63 : vector<1x64xf32> to vector<16x64xf32>
    %65 = arith.addf %62, %64 : vector<16x64xf32>
    %c1_30 = arith.constant 1 : index
    %c0_31 = arith.constant 0 : index
    %c0_32 = arith.constant 0 : index
    %66 = vector.load %arg1[%c1_30, %c0_31, %c0_32] : memref<9x64x64xf32, #tpu.memory_space<vmem>>, vector<1x64x64xf32>
    %67 = vector.shape_cast %66 : vector<1x64x64xf32> to vector<64x64xf32>
    %cst_33 = arith.constant dense<0.000000e+00> : vector<16x64xf32>
    %68 = tpu.matmul %59, %67, %cst_33 {dimension_numbers = #tpu.dot_dimension_numbers<[1], [0], [0], [1], [0, 0, 1, 1], [], []>} : vector<16x64xf32>, vector<64x64xf32>, vector<16x64xf32> -> vector<16x64xf32>
    %69 = vector.extract_strided_slice %0 {offsets = [8, 0], sizes = [1, 64], strides = [1, 1]} : vector<25x64xf32> to vector<1x64xf32>
    %70 = vector.broadcast %69 : vector<1x64xf32> to vector<16x64xf32>
    %71 = arith.addf %68, %70 : vector<16x64xf32>
    %c2 = arith.constant 2 : index
    %c0_34 = arith.constant 0 : index
    %c0_35 = arith.constant 0 : index
    %72 = vector.load %arg1[%c2, %c0_34, %c0_35] : memref<9x64x64xf32, #tpu.memory_space<vmem>>, vector<1x64x64xf32>
    %73 = vector.shape_cast %72 : vector<1x64x64xf32> to vector<64x64xf32>
    %cst_36 = arith.constant dense<0.000000e+00> : vector<16x64xf32>
    %74 = tpu.matmul %59, %73, %cst_36 {dimension_numbers = #tpu.dot_dimension_numbers<[1], [0], [0], [1], [0, 0, 1, 1], [], []>} : vector<16x64xf32>, vector<64x64xf32>, vector<16x64xf32> -> vector<16x64xf32>
    %75 = vector.extract_strided_slice %0 {offsets = [9, 0], sizes = [1, 64], strides = [1, 1]} : vector<25x64xf32> to vector<1x64xf32>
    %76 = vector.broadcast %75 : vector<1x64xf32> to vector<16x64xf32>
    %77 = arith.addf %74, %76 : vector<16x64xf32>
    %c3 = arith.constant 3 : index
    %c0_37 = arith.constant 0 : index
    %c0_38 = arith.constant 0 : index
    %78 = vector.load %arg1[%c3, %c0_37, %c0_38] : memref<9x64x64xf32, #tpu.memory_space<vmem>>, vector<1x64x64xf32>
    %79 = vector.shape_cast %78 : vector<1x64x64xf32> to vector<64x64xf32>
    %cst_39 = arith.constant dense<0.000000e+00> : vector<16x64xf32>
    %80 = tpu.matmul %59, %79, %cst_39 {dimension_numbers = #tpu.dot_dimension_numbers<[1], [0], [0], [1], [0, 0, 1, 1], [], []>} : vector<16x64xf32>, vector<64x64xf32>, vector<16x64xf32> -> vector<16x64xf32>
    %81 = vector.extract_strided_slice %0 {offsets = [10, 0], sizes = [1, 64], strides = [1, 1]} : vector<25x64xf32> to vector<1x64xf32>
    %82 = vector.broadcast %81 : vector<1x64xf32> to vector<16x64xf32>
    %83 = arith.addf %80, %82 : vector<16x64xf32>
    %c4 = arith.constant 4 : index
    %c0_40 = arith.constant 0 : index
    %c0_41 = arith.constant 0 : index
    %84 = vector.load %arg1[%c4, %c0_40, %c0_41] : memref<9x64x64xf32, #tpu.memory_space<vmem>>, vector<1x64x64xf32>
    %85 = vector.shape_cast %84 : vector<1x64x64xf32> to vector<64x64xf32>
    %cst_42 = arith.constant dense<0.000000e+00> : vector<16x64xf32>
    %86 = tpu.matmul %59, %85, %cst_42 {dimension_numbers = #tpu.dot_dimension_numbers<[1], [0], [0], [1], [0, 0, 1, 1], [], []>} : vector<16x64xf32>, vector<64x64xf32>, vector<16x64xf32> -> vector<16x64xf32>
    %87 = vector.extract_strided_slice %0 {offsets = [11, 0], sizes = [1, 64], strides = [1, 1]} : vector<25x64xf32> to vector<1x64xf32>
    %88 = vector.broadcast %87 : vector<1x64xf32> to vector<16x64xf32>
    %89 = arith.addf %86, %88 : vector<16x64xf32>
    %90 = arith.mulf %65, %3 : vector<16x64xf32>
    %91 = arith.mulf %71, %4 : vector<16x64xf32>
    %92 = arith.addf %90, %91 : vector<16x64xf32>
    %93 = arith.mulf %77, %3 : vector<16x64xf32>
    %94 = arith.mulf %83, %4 : vector<16x64xf32>
    %95 = arith.addf %93, %94 : vector<16x64xf32>
    %96 = vector.extract_strided_slice %92 {offsets = [0, 0], sizes = [8, 64], strides = [1, 1]} : vector<16x64xf32> to vector<8x64xf32>
    %97 = vector.extract_strided_slice %95 {offsets = [0, 0], sizes = [8, 64], strides = [1, 1]} : vector<16x64xf32> to vector<8x64xf32>
    %98 = vector.extract_strided_slice %89 {offsets = [0, 0], sizes = [8, 64], strides = [1, 1]} : vector<16x64xf32> to vector<8x64xf32>
    %99 = vector.extract_strided_slice %96 {offsets = [0, 0], sizes = [8, 16], strides = [1, 1]} : vector<8x64xf32> to vector<8x16xf32>
    %100 = vector.extract_strided_slice %97 {offsets = [0, 0], sizes = [8, 16], strides = [1, 1]} : vector<8x64xf32> to vector<8x16xf32>
    %cst_43 = arith.constant dense<0.000000e+00> : vector<8x8xf32>
    %101 = tpu.matmul %99, %100, %cst_43 {dimension_numbers = #tpu.dot_dimension_numbers<[1], [1], [0], [0], [0, 0, 1, 0], [], []>} : vector<8x16xf32>, vector<8x16xf32>, vector<8x8xf32> -> vector<8x8xf32>
    %cst_44 = arith.constant 2.500000e-01 : f32
    %102 = vector.broadcast %cst_44 : f32 to vector<8x8xf32>
    %103 = arith.mulf %101, %102 : vector<8x8xf32>
    %cst_45 = arith.constant dense<0xFF800000> : vector<8xf32>
    %104 = vector.multi_reduction <maximumf>, %103, %cst_45 [1] : vector<8x8xf32> to vector<8xf32>
    %105 = vector.shape_cast %104 : vector<8xf32> to vector<8x1xf32>
    %106 = vector.broadcast %105 : vector<8x1xf32> to vector<8x8xf32>
    %107 = arith.subf %103, %106 : vector<8x8xf32>
    %108 = math.exp %107 : vector<8x8xf32>
    %cst_46 = arith.constant dense<0.000000e+00> : vector<8xf32>
    %109 = vector.multi_reduction <add>, %108, %cst_46 [1] : vector<8x8xf32> to vector<8xf32>
    %110 = vector.shape_cast %109 : vector<8xf32> to vector<8x1xf32>
    %111 = tpu.reciprocal %110 {approx = true} : vector<8x1xf32> -> vector<8x1xf32>
    %112 = vector.broadcast %111 : vector<8x1xf32> to vector<8x8xf32>
    %113 = arith.mulf %108, %112 : vector<8x8xf32>
    %114 = vector.extract_strided_slice %98 {offsets = [0, 0], sizes = [8, 16], strides = [1, 1]} : vector<8x64xf32> to vector<8x16xf32>
    %cst_47 = arith.constant dense<0.000000e+00> : vector<8x16xf32>
    %115 = tpu.matmul %113, %114, %cst_47 {dimension_numbers = #tpu.dot_dimension_numbers<[1], [0], [0], [1], [0, 0, 1, 1], [], []>} : vector<8x8xf32>, vector<8x16xf32>, vector<8x16xf32> -> vector<8x16xf32>
    %c0_48 = arith.constant 0 : index
    %c0_49 = arith.constant 0 : index
    %116 = vector.load %arg7[%c0_48, %c0_49] : memref<16x64xf32, #tpu.memory_space<vmem>>, vector<8x16xf32>
    tpu.vector_store %arg7[%c0_48, %c0_49], %115 {strides = array<i32>} : memref<16x64xf32, #tpu.memory_space<vmem>>, vector<8x16xf32>,
    %117 = vector.extract_strided_slice %96 {offsets = [0, 16], sizes = [8, 16], strides = [1, 1]} : vector<8x64xf32> to vector<8x16xf32>
    %118 = vector.extract_strided_slice %97 {offsets = [0, 16], sizes = [8, 16], strides = [1, 1]} : vector<8x64xf32> to vector<8x16xf32>
    %cst_50 = arith.constant dense<0.000000e+00> : vector<8x8xf32>
    %119 = tpu.matmul %117, %118, %cst_50 {dimension_numbers = #tpu.dot_dimension_numbers<[1], [1], [0], [0], [0, 0, 1, 0], [], []>} : vector<8x16xf32>, vector<8x16xf32>, vector<8x8xf32> -> vector<8x8xf32>
    %cst_51 = arith.constant 2.500000e-01 : f32
    %120 = vector.broadcast %cst_51 : f32 to vector<8x8xf32>
    %121 = arith.mulf %119, %120 : vector<8x8xf32>
    %cst_52 = arith.constant dense<0xFF800000> : vector<8xf32>
    %122 = vector.multi_reduction <maximumf>, %121, %cst_52 [1] : vector<8x8xf32> to vector<8xf32>
    %123 = vector.shape_cast %122 : vector<8xf32> to vector<8x1xf32>
    %124 = vector.broadcast %123 : vector<8x1xf32> to vector<8x8xf32>
    %125 = arith.subf %121, %124 : vector<8x8xf32>
    %126 = math.exp %125 : vector<8x8xf32>
    %cst_53 = arith.constant dense<0.000000e+00> : vector<8xf32>
    %127 = vector.multi_reduction <add>, %126, %cst_53 [1] : vector<8x8xf32> to vector<8xf32>
    %128 = vector.shape_cast %127 : vector<8xf32> to vector<8x1xf32>
    %129 = tpu.reciprocal %128 {approx = true} : vector<8x1xf32> -> vector<8x1xf32>
    %130 = vector.broadcast %129 : vector<8x1xf32> to vector<8x8xf32>
    %131 = arith.mulf %126, %130 : vector<8x8xf32>
    %132 = vector.extract_strided_slice %98 {offsets = [0, 16], sizes = [8, 16], strides = [1, 1]} : vector<8x64xf32> to vector<8x16xf32>
    %cst_54 = arith.constant dense<0.000000e+00> : vector<8x16xf32>
    %133 = tpu.matmul %131, %132, %cst_54 {dimension_numbers = #tpu.dot_dimension_numbers<[1], [0], [0], [1], [0, 0, 1, 1], [], []>} : vector<8x8xf32>, vector<8x16xf32>, vector<8x16xf32> -> vector<8x16xf32>
    %c0_55 = arith.constant 0 : index
    %c16_56 = arith.constant 16 : index
    %134 = vector.load %arg7[%c0_55, %c16_56] : memref<16x64xf32, #tpu.memory_space<vmem>>, vector<8x16xf32>
    tpu.vector_store %arg7[%c0_55, %c16_56], %133 {strides = array<i32>} : memref<16x64xf32, #tpu.memory_space<vmem>>, vector<8x16xf32>,
    %135 = vector.extract_strided_slice %96 {offsets = [0, 32], sizes = [8, 16], strides = [1, 1]} : vector<8x64xf32> to vector<8x16xf32>
    %136 = vector.extract_strided_slice %97 {offsets = [0, 32], sizes = [8, 16], strides = [1, 1]} : vector<8x64xf32> to vector<8x16xf32>
    %cst_57 = arith.constant dense<0.000000e+00> : vector<8x8xf32>
    %137 = tpu.matmul %135, %136, %cst_57 {dimension_numbers = #tpu.dot_dimension_numbers<[1], [1], [0], [0], [0, 0, 1, 0], [], []>} : vector<8x16xf32>, vector<8x16xf32>, vector<8x8xf32> -> vector<8x8xf32>
    %cst_58 = arith.constant 2.500000e-01 : f32
    %138 = vector.broadcast %cst_58 : f32 to vector<8x8xf32>
    %139 = arith.mulf %137, %138 : vector<8x8xf32>
    %cst_59 = arith.constant dense<0xFF800000> : vector<8xf32>
    %140 = vector.multi_reduction <maximumf>, %139, %cst_59 [1] : vector<8x8xf32> to vector<8xf32>
    %141 = vector.shape_cast %140 : vector<8xf32> to vector<8x1xf32>
    %142 = vector.broadcast %141 : vector<8x1xf32> to vector<8x8xf32>
    %143 = arith.subf %139, %142 : vector<8x8xf32>
    %144 = math.exp %143 : vector<8x8xf32>
    %cst_60 = arith.constant dense<0.000000e+00> : vector<8xf32>
    %145 = vector.multi_reduction <add>, %144, %cst_60 [1] : vector<8x8xf32> to vector<8xf32>
    %146 = vector.shape_cast %145 : vector<8xf32> to vector<8x1xf32>
    %147 = tpu.reciprocal %146 {approx = true} : vector<8x1xf32> -> vector<8x1xf32>
    %148 = vector.broadcast %147 : vector<8x1xf32> to vector<8x8xf32>
    %149 = arith.mulf %144, %148 : vector<8x8xf32>
    %150 = vector.extract_strided_slice %98 {offsets = [0, 32], sizes = [8, 16], strides = [1, 1]} : vector<8x64xf32> to vector<8x16xf32>
    %cst_61 = arith.constant dense<0.000000e+00> : vector<8x16xf32>
    %151 = tpu.matmul %149, %150, %cst_61 {dimension_numbers = #tpu.dot_dimension_numbers<[1], [0], [0], [1], [0, 0, 1, 1], [], []>} : vector<8x8xf32>, vector<8x16xf32>, vector<8x16xf32> -> vector<8x16xf32>
    %c0_62 = arith.constant 0 : index
    %c32_63 = arith.constant 32 : index
    %152 = vector.load %arg7[%c0_62, %c32_63] : memref<16x64xf32, #tpu.memory_space<vmem>>, vector<8x16xf32>
    tpu.vector_store %arg7[%c0_62, %c32_63], %151 {strides = array<i32>} : memref<16x64xf32, #tpu.memory_space<vmem>>, vector<8x16xf32>,
    %153 = vector.extract_strided_slice %96 {offsets = [0, 48], sizes = [8, 16], strides = [1, 1]} : vector<8x64xf32> to vector<8x16xf32>
    %154 = vector.extract_strided_slice %97 {offsets = [0, 48], sizes = [8, 16], strides = [1, 1]} : vector<8x64xf32> to vector<8x16xf32>
    %cst_64 = arith.constant dense<0.000000e+00> : vector<8x8xf32>
    %155 = tpu.matmul %153, %154, %cst_64 {dimension_numbers = #tpu.dot_dimension_numbers<[1], [1], [0], [0], [0, 0, 1, 0], [], []>} : vector<8x16xf32>, vector<8x16xf32>, vector<8x8xf32> -> vector<8x8xf32>
    %cst_65 = arith.constant 2.500000e-01 : f32
    %156 = vector.broadcast %cst_65 : f32 to vector<8x8xf32>
    %157 = arith.mulf %155, %156 : vector<8x8xf32>
    %cst_66 = arith.constant dense<0xFF800000> : vector<8xf32>
    %158 = vector.multi_reduction <maximumf>, %157, %cst_66 [1] : vector<8x8xf32> to vector<8xf32>
    %159 = vector.shape_cast %158 : vector<8xf32> to vector<8x1xf32>
    %160 = vector.broadcast %159 : vector<8x1xf32> to vector<8x8xf32>
    %161 = arith.subf %157, %160 : vector<8x8xf32>
    %162 = math.exp %161 : vector<8x8xf32>
    %cst_67 = arith.constant dense<0.000000e+00> : vector<8xf32>
    %163 = vector.multi_reduction <add>, %162, %cst_67 [1] : vector<8x8xf32> to vector<8xf32>
    %164 = vector.shape_cast %163 : vector<8xf32> to vector<8x1xf32>
    %165 = tpu.reciprocal %164 {approx = true} : vector<8x1xf32> -> vector<8x1xf32>
    %166 = vector.broadcast %165 : vector<8x1xf32> to vector<8x8xf32>
    %167 = arith.mulf %162, %166 : vector<8x8xf32>
    %168 = vector.extract_strided_slice %98 {offsets = [0, 48], sizes = [8, 16], strides = [1, 1]} : vector<8x64xf32> to vector<8x16xf32>
    %cst_68 = arith.constant dense<0.000000e+00> : vector<8x16xf32>
    %169 = tpu.matmul %167, %168, %cst_68 {dimension_numbers = #tpu.dot_dimension_numbers<[1], [0], [0], [1], [0, 0, 1, 1], [], []>} : vector<8x8xf32>, vector<8x16xf32>, vector<8x16xf32> -> vector<8x16xf32>
    %c0_69 = arith.constant 0 : index
    %c48_70 = arith.constant 48 : index
    %170 = vector.load %arg7[%c0_69, %c48_70] : memref<16x64xf32, #tpu.memory_space<vmem>>, vector<8x16xf32>
    tpu.vector_store %arg7[%c0_69, %c48_70], %169 {strides = array<i32>} : memref<16x64xf32, #tpu.memory_space<vmem>>, vector<8x16xf32>,
    %171 = vector.extract_strided_slice %92 {offsets = [8, 0], sizes = [8, 64], strides = [1, 1]} : vector<16x64xf32> to vector<8x64xf32>
    %172 = vector.extract_strided_slice %95 {offsets = [8, 0], sizes = [8, 64], strides = [1, 1]} : vector<16x64xf32> to vector<8x64xf32>
    %173 = vector.extract_strided_slice %89 {offsets = [8, 0], sizes = [8, 64], strides = [1, 1]} : vector<16x64xf32> to vector<8x64xf32>
    %174 = vector.extract_strided_slice %171 {offsets = [0, 0], sizes = [8, 16], strides = [1, 1]} : vector<8x64xf32> to vector<8x16xf32>
    %175 = vector.extract_strided_slice %172 {offsets = [0, 0], sizes = [8, 16], strides = [1, 1]} : vector<8x64xf32> to vector<8x16xf32>
    %cst_71 = arith.constant dense<0.000000e+00> : vector<8x8xf32>
    %176 = tpu.matmul %174, %175, %cst_71 {dimension_numbers = #tpu.dot_dimension_numbers<[1], [1], [0], [0], [0, 0, 1, 0], [], []>} : vector<8x16xf32>, vector<8x16xf32>, vector<8x8xf32> -> vector<8x8xf32>
    %cst_72 = arith.constant 2.500000e-01 : f32
    %177 = vector.broadcast %cst_72 : f32 to vector<8x8xf32>
    %178 = arith.mulf %176, %177 : vector<8x8xf32>
    %cst_73 = arith.constant dense<0xFF800000> : vector<8xf32>
    %179 = vector.multi_reduction <maximumf>, %178, %cst_73 [1] : vector<8x8xf32> to vector<8xf32>
    %180 = vector.shape_cast %179 : vector<8xf32> to vector<8x1xf32>
    %181 = vector.broadcast %180 : vector<8x1xf32> to vector<8x8xf32>
    %182 = arith.subf %178, %181 : vector<8x8xf32>
    %183 = math.exp %182 : vector<8x8xf32>
    %cst_74 = arith.constant dense<0.000000e+00> : vector<8xf32>
    %184 = vector.multi_reduction <add>, %183, %cst_74 [1] : vector<8x8xf32> to vector<8xf32>
    %185 = vector.shape_cast %184 : vector<8xf32> to vector<8x1xf32>
    %186 = tpu.reciprocal %185 {approx = true} : vector<8x1xf32> -> vector<8x1xf32>
    %187 = vector.broadcast %186 : vector<8x1xf32> to vector<8x8xf32>
    %188 = arith.mulf %183, %187 : vector<8x8xf32>
    %189 = vector.extract_strided_slice %173 {offsets = [0, 0], sizes = [8, 16], strides = [1, 1]} : vector<8x64xf32> to vector<8x16xf32>
    %cst_75 = arith.constant dense<0.000000e+00> : vector<8x16xf32>
    %190 = tpu.matmul %188, %189, %cst_75 {dimension_numbers = #tpu.dot_dimension_numbers<[1], [0], [0], [1], [0, 0, 1, 1], [], []>} : vector<8x8xf32>, vector<8x16xf32>, vector<8x16xf32> -> vector<8x16xf32>
    %c8 = arith.constant 8 : index
    %c0_76 = arith.constant 0 : index
    %191 = vector.load %arg7[%c8, %c0_76] : memref<16x64xf32, #tpu.memory_space<vmem>>, vector<8x16xf32>
    tpu.vector_store %arg7[%c8, %c0_76], %190 {strides = array<i32>} : memref<16x64xf32, #tpu.memory_space<vmem>>, vector<8x16xf32>,
    %192 = vector.extract_strided_slice %171 {offsets = [0, 16], sizes = [8, 16], strides = [1, 1]} : vector<8x64xf32> to vector<8x16xf32>
    %193 = vector.extract_strided_slice %172 {offsets = [0, 16], sizes = [8, 16], strides = [1, 1]} : vector<8x64xf32> to vector<8x16xf32>
    %cst_77 = arith.constant dense<0.000000e+00> : vector<8x8xf32>
    %194 = tpu.matmul %192, %193, %cst_77 {dimension_numbers = #tpu.dot_dimension_numbers<[1], [1], [0], [0], [0, 0, 1, 0], [], []>} : vector<8x16xf32>, vector<8x16xf32>, vector<8x8xf32> -> vector<8x8xf32>
    %cst_78 = arith.constant 2.500000e-01 : f32
    %195 = vector.broadcast %cst_78 : f32 to vector<8x8xf32>
    %196 = arith.mulf %194, %195 : vector<8x8xf32>
    %cst_79 = arith.constant dense<0xFF800000> : vector<8xf32>
    %197 = vector.multi_reduction <maximumf>, %196, %cst_79 [1] : vector<8x8xf32> to vector<8xf32>
    %198 = vector.shape_cast %197 : vector<8xf32> to vector<8x1xf32>
    %199 = vector.broadcast %198 : vector<8x1xf32> to vector<8x8xf32>
    %200 = arith.subf %196, %199 : vector<8x8xf32>
    %201 = math.exp %200 : vector<8x8xf32>
    %cst_80 = arith.constant dense<0.000000e+00> : vector<8xf32>
    %202 = vector.multi_reduction <add>, %201, %cst_80 [1] : vector<8x8xf32> to vector<8xf32>
    %203 = vector.shape_cast %202 : vector<8xf32> to vector<8x1xf32>
    %204 = tpu.reciprocal %203 {approx = true} : vector<8x1xf32> -> vector<8x1xf32>
    %205 = vector.broadcast %204 : vector<8x1xf32> to vector<8x8xf32>
    %206 = arith.mulf %201, %205 : vector<8x8xf32>
    %207 = vector.extract_strided_slice %173 {offsets = [0, 16], sizes = [8, 16], strides = [1, 1]} : vector<8x64xf32> to vector<8x16xf32>
    %cst_81 = arith.constant dense<0.000000e+00> : vector<8x16xf32>
    %208 = tpu.matmul %206, %207, %cst_81 {dimension_numbers = #tpu.dot_dimension_numbers<[1], [0], [0], [1], [0, 0, 1, 1], [], []>} : vector<8x8xf32>, vector<8x16xf32>, vector<8x16xf32> -> vector<8x16xf32>
    %c8_82 = arith.constant 8 : index
    %c16_83 = arith.constant 16 : index
    %209 = vector.load %arg7[%c8_82, %c16_83] : memref<16x64xf32, #tpu.memory_space<vmem>>, vector<8x16xf32>
    tpu.vector_store %arg7[%c8_82, %c16_83], %208 {strides = array<i32>} : memref<16x64xf32, #tpu.memory_space<vmem>>, vector<8x16xf32>,
    %210 = vector.extract_strided_slice %171 {offsets = [0, 32], sizes = [8, 16], strides = [1, 1]} : vector<8x64xf32> to vector<8x16xf32>
    %211 = vector.extract_strided_slice %172 {offsets = [0, 32], sizes = [8, 16], strides = [1, 1]} : vector<8x64xf32> to vector<8x16xf32>
    %cst_84 = arith.constant dense<0.000000e+00> : vector<8x8xf32>
    %212 = tpu.matmul %210, %211, %cst_84 {dimension_numbers = #tpu.dot_dimension_numbers<[1], [1], [0], [0], [0, 0, 1, 0], [], []>} : vector<8x16xf32>, vector<8x16xf32>, vector<8x8xf32> -> vector<8x8xf32>
    %cst_85 = arith.constant 2.500000e-01 : f32
    %213 = vector.broadcast %cst_85 : f32 to vector<8x8xf32>
    %214 = arith.mulf %212, %213 : vector<8x8xf32>
    %cst_86 = arith.constant dense<0xFF800000> : vector<8xf32>
    %215 = vector.multi_reduction <maximumf>, %214, %cst_86 [1] : vector<8x8xf32> to vector<8xf32>
    %216 = vector.shape_cast %215 : vector<8xf32> to vector<8x1xf32>
    %217 = vector.broadcast %216 : vector<8x1xf32> to vector<8x8xf32>
    %218 = arith.subf %214, %217 : vector<8x8xf32>
    %219 = math.exp %218 : vector<8x8xf32>
    %cst_87 = arith.constant dense<0.000000e+00> : vector<8xf32>
    %220 = vector.multi_reduction <add>, %219, %cst_87 [1] : vector<8x8xf32> to vector<8xf32>
    %221 = vector.shape_cast %220 : vector<8xf32> to vector<8x1xf32>
    %222 = tpu.reciprocal %221 {approx = true} : vector<8x1xf32> -> vector<8x1xf32>
    %223 = vector.broadcast %222 : vector<8x1xf32> to vector<8x8xf32>
    %224 = arith.mulf %219, %223 : vector<8x8xf32>
    %225 = vector.extract_strided_slice %173 {offsets = [0, 32], sizes = [8, 16], strides = [1, 1]} : vector<8x64xf32> to vector<8x16xf32>
    %cst_88 = arith.constant dense<0.000000e+00> : vector<8x16xf32>
    %226 = tpu.matmul %224, %225, %cst_88 {dimension_numbers = #tpu.dot_dimension_numbers<[1], [0], [0], [1], [0, 0, 1, 1], [], []>} : vector<8x8xf32>, vector<8x16xf32>, vector<8x16xf32> -> vector<8x16xf32>
    %c8_89 = arith.constant 8 : index
    %c32_90 = arith.constant 32 : index
    %227 = vector.load %arg7[%c8_89, %c32_90] : memref<16x64xf32, #tpu.memory_space<vmem>>, vector<8x16xf32>
    tpu.vector_store %arg7[%c8_89, %c32_90], %226 {strides = array<i32>} : memref<16x64xf32, #tpu.memory_space<vmem>>, vector<8x16xf32>,
    %228 = vector.extract_strided_slice %171 {offsets = [0, 48], sizes = [8, 16], strides = [1, 1]} : vector<8x64xf32> to vector<8x16xf32>
    %229 = vector.extract_strided_slice %172 {offsets = [0, 48], sizes = [8, 16], strides = [1, 1]} : vector<8x64xf32> to vector<8x16xf32>
    %cst_91 = arith.constant dense<0.000000e+00> : vector<8x8xf32>
    %230 = tpu.matmul %228, %229, %cst_91 {dimension_numbers = #tpu.dot_dimension_numbers<[1], [1], [0], [0], [0, 0, 1, 0], [], []>} : vector<8x16xf32>, vector<8x16xf32>, vector<8x8xf32> -> vector<8x8xf32>
    %cst_92 = arith.constant 2.500000e-01 : f32
    %231 = vector.broadcast %cst_92 : f32 to vector<8x8xf32>
    %232 = arith.mulf %230, %231 : vector<8x8xf32>
    %cst_93 = arith.constant dense<0xFF800000> : vector<8xf32>
    %233 = vector.multi_reduction <maximumf>, %232, %cst_93 [1] : vector<8x8xf32> to vector<8xf32>
    %234 = vector.shape_cast %233 : vector<8xf32> to vector<8x1xf32>
    %235 = vector.broadcast %234 : vector<8x1xf32> to vector<8x8xf32>
    %236 = arith.subf %232, %235 : vector<8x8xf32>
    %237 = math.exp %236 : vector<8x8xf32>
    %cst_94 = arith.constant dense<0.000000e+00> : vector<8xf32>
    %238 = vector.multi_reduction <add>, %237, %cst_94 [1] : vector<8x8xf32> to vector<8xf32>
    %239 = vector.shape_cast %238 : vector<8xf32> to vector<8x1xf32>
    %240 = tpu.reciprocal %239 {approx = true} : vector<8x1xf32> -> vector<8x1xf32>
    %241 = vector.broadcast %240 : vector<8x1xf32> to vector<8x8xf32>
    %242 = arith.mulf %237, %241 : vector<8x8xf32>
    %243 = vector.extract_strided_slice %173 {offsets = [0, 48], sizes = [8, 16], strides = [1, 1]} : vector<8x64xf32> to vector<8x16xf32>
    %cst_95 = arith.constant dense<0.000000e+00> : vector<8x16xf32>
    %244 = tpu.matmul %242, %243, %cst_95 {dimension_numbers = #tpu.dot_dimension_numbers<[1], [0], [0], [1], [0, 0, 1, 1], [], []>} : vector<8x8xf32>, vector<8x16xf32>, vector<8x16xf32> -> vector<8x16xf32>
    %c8_96 = arith.constant 8 : index
    %c48_97 = arith.constant 48 : index
    %245 = vector.load %arg7[%c8_96, %c48_97] : memref<16x64xf32, #tpu.memory_space<vmem>>, vector<8x16xf32>
    tpu.vector_store %arg7[%c8_96, %c48_97], %244 {strides = array<i32>} : memref<16x64xf32, #tpu.memory_space<vmem>>, vector<8x16xf32>,
    %c0_98 = arith.constant 0 : index
    %c0_99 = arith.constant 0 : index
    %246 = vector.load %arg7[%c0_98, %c0_99] : memref<16x64xf32, #tpu.memory_space<vmem>>, vector<16x64xf32>
    %c5 = arith.constant 5 : index
    %c0_100 = arith.constant 0 : index
    %c0_101 = arith.constant 0 : index
    %247 = vector.load %arg1[%c5, %c0_100, %c0_101] : memref<9x64x64xf32, #tpu.memory_space<vmem>>, vector<1x64x64xf32>
    %248 = vector.shape_cast %247 : vector<1x64x64xf32> to vector<64x64xf32>
    %cst_102 = arith.constant dense<0.000000e+00> : vector<16x64xf32>
    %249 = tpu.matmul %246, %248, %cst_102 {dimension_numbers = #tpu.dot_dimension_numbers<[1], [0], [0], [1], [0, 0, 1, 1], [], []>} : vector<16x64xf32>, vector<64x64xf32>, vector<16x64xf32> -> vector<16x64xf32>
    %250 = arith.addf %46, %249 : vector<16x64xf32>
    %251 = vector.extract_strided_slice %0 {offsets = [12, 0], sizes = [1, 64], strides = [1, 1]} : vector<25x64xf32> to vector<1x64xf32>
    %252 = vector.broadcast %251 : vector<1x64xf32> to vector<16x64xf32>
    %253 = arith.addf %250, %252 : vector<16x64xf32>
    %254 = vector.extract_strided_slice %0 {offsets = [2, 0], sizes = [1, 64], strides = [1, 1]} : vector<25x64xf32> to vector<1x64xf32>
    %255 = arith.mulf %253, %253 : vector<16x64xf32>
    %cst_103 = arith.constant dense<0.000000e+00> : vector<16xf32>
    %256 = vector.multi_reduction <add>, %255, %cst_103 [1] : vector<16x64xf32> to vector<16xf32>
    %257 = vector.shape_cast %256 : vector<16xf32> to vector<16x1xf32>
    %cst_104 = arith.constant 6.400000e+01 : f32
    %258 = vector.broadcast %cst_104 : f32 to vector<16x1xf32>
    %259 = arith.divf %257, %258 : vector<16x1xf32>
    %cst_105 = arith.constant 9.99999974E-6 : f32
    %260 = vector.broadcast %cst_105 : f32 to vector<16x1xf32>
    %261 = arith.addf %259, %260 : vector<16x1xf32>
    %262 = math.rsqrt %261 : vector<16x1xf32>
    %263 = vector.broadcast %262 : vector<16x1xf32> to vector<16x64xf32>
    %264 = arith.mulf %253, %263 : vector<16x64xf32>
    %265 = vector.broadcast %254 : vector<1x64xf32> to vector<16x64xf32>
    %266 = arith.mulf %264, %265 : vector<16x64xf32>
    %c6 = arith.constant 6 : index
    %c0_106 = arith.constant 0 : index
    %c0_107 = arith.constant 0 : index
    %267 = vector.load %arg1[%c6, %c0_106, %c0_107] : memref<9x64x64xf32, #tpu.memory_space<vmem>>, vector<1x64x64xf32>
    %268 = vector.shape_cast %267 : vector<1x64x64xf32> to vector<64x64xf32>
    %cst_108 = arith.constant dense<0.000000e+00> : vector<16x64xf32>
    %269 = tpu.matmul %266, %268, %cst_108 {dimension_numbers = #tpu.dot_dimension_numbers<[1], [0], [0], [1], [0, 0, 1, 1], [], []>} : vector<16x64xf32>, vector<64x64xf32>, vector<16x64xf32> -> vector<16x64xf32>
    %270 = vector.extract_strided_slice %0 {offsets = [13, 0], sizes = [1, 64], strides = [1, 1]} : vector<25x64xf32> to vector<1x64xf32>
    %271 = vector.broadcast %270 : vector<1x64xf32> to vector<16x64xf32>
    %272 = arith.addf %269, %271 : vector<16x64xf32>
    %c7 = arith.constant 7 : index
    %c0_109 = arith.constant 0 : index
    %c0_110 = arith.constant 0 : index
    %273 = vector.load %arg1[%c7, %c0_109, %c0_110] : memref<9x64x64xf32, #tpu.memory_space<vmem>>, vector<1x64x64xf32>
    %274 = vector.shape_cast %273 : vector<1x64x64xf32> to vector<64x64xf32>
    %cst_111 = arith.constant dense<0.000000e+00> : vector<16x64xf32>
    %275 = tpu.matmul %266, %274, %cst_111 {dimension_numbers = #tpu.dot_dimension_numbers<[1], [0], [0], [1], [0, 0, 1, 1], [], []>} : vector<16x64xf32>, vector<64x64xf32>, vector<16x64xf32> -> vector<16x64xf32>
    %276 = vector.extract_strided_slice %0 {offsets = [14, 0], sizes = [1, 64], strides = [1, 1]} : vector<25x64xf32> to vector<1x64xf32>
    %277 = vector.broadcast %276 : vector<1x64xf32> to vector<16x64xf32>
    %278 = arith.addf %275, %277 : vector<16x64xf32>
    %279 = arith.negf %278 : vector<16x64xf32>
    %280 = math.exp %279 : vector<16x64xf32>
    %cst_112 = arith.constant 1.000000e+00 : f32
    %281 = vector.broadcast %cst_112 : f32 to vector<16x64xf32>
    %282 = arith.addf %281, %280 : vector<16x64xf32>
    %283 = arith.divf %281, %282 : vector<16x64xf32>
    %284 = arith.mulf %272, %283 : vector<16x64xf32>
    %285 = vector.extract_strided_slice %0 {offsets = [24, 0], sizes = [1, 64], strides = [1, 1]} : vector<25x64xf32> to vector<1x64xf32>
    %286 = vector.broadcast %285 : vector<1x64xf32> to vector<16x64xf32>
    %287 = arith.mulf %284, %286 : vector<16x64xf32>
    %c1_i32 = arith.constant 1 : i32
    %288 = tpu.dynamic_rotate %284 by %c1_i32 dim 0 : vector<16x64xf32>, i32 -> vector<16x64xf32>
    %cst_113 = arith.constant 1.000000e+00 : f32
    %289 = vector.broadcast %cst_113 : f32 to vector<16x64xf32>
    %290 = arith.cmpf oge, %5, %289 : vector<16x64xf32>
    %cst_114 = arith.constant 0.000000e+00 : f32
    %291 = vector.broadcast %cst_114 : f32 to vector<16x64xf32>
    %292 = arith.select %290, %288, %291 : vector<16x64xi1>, vector<16x64xf32>
    %293 = vector.extract_strided_slice %0 {offsets = [23, 0], sizes = [1, 64], strides = [1, 1]} : vector<25x64xf32> to vector<1x64xf32>
    %294 = vector.broadcast %293 : vector<1x64xf32> to vector<16x64xf32>
    %295 = arith.mulf %292, %294 : vector<16x64xf32>
    %296 = arith.addf %287, %295 : vector<16x64xf32>
    %c2_i32 = arith.constant 2 : i32
    %297 = tpu.dynamic_rotate %284 by %c2_i32 dim 0 : vector<16x64xf32>, i32 -> vector<16x64xf32>
    %cst_115 = arith.constant 2.000000e+00 : f32
    %298 = vector.broadcast %cst_115 : f32 to vector<16x64xf32>
    %299 = arith.cmpf oge, %5, %298 : vector<16x64xf32>
    %cst_116 = arith.constant 0.000000e+00 : f32
    %300 = vector.broadcast %cst_116 : f32 to vector<16x64xf32>
    %301 = arith.select %299, %297, %300 : vector<16x64xi1>, vector<16x64xf32>
    %302 = vector.extract_strided_slice %0 {offsets = [22, 0], sizes = [1, 64], strides = [1, 1]} : vector<25x64xf32> to vector<1x64xf32>
    %303 = vector.broadcast %302 : vector<1x64xf32> to vector<16x64xf32>
    %304 = arith.mulf %301, %303 : vector<16x64xf32>
    %305 = arith.addf %296, %304 : vector<16x64xf32>
    %c3_i32 = arith.constant 3 : i32
    %306 = tpu.dynamic_rotate %284 by %c3_i32 dim 0 : vector<16x64xf32>, i32 -> vector<16x64xf32>
    %cst_117 = arith.constant 3.000000e+00 : f32
    %307 = vector.broadcast %cst_117 : f32 to vector<16x64xf32>
    %308 = arith.cmpf oge, %5, %307 : vector<16x64xf32>
    %cst_118 = arith.constant 0.000000e+00 : f32
    %309 = vector.broadcast %cst_118 : f32 to vector<16x64xf32>
    %310 = arith.select %308, %306, %309 : vector<16x64xi1>, vector<16x64xf32>
    %311 = vector.extract_strided_slice %0 {offsets = [21, 0], sizes = [1, 64], strides = [1, 1]} : vector<25x64xf32> to vector<1x64xf32>
    %312 = vector.broadcast %311 : vector<1x64xf32> to vector<16x64xf32>
    %313 = arith.mulf %310, %312 : vector<16x64xf32>
    %314 = arith.addf %305, %313 : vector<16x64xf32>
    %c4_i32 = arith.constant 4 : i32
    %315 = tpu.dynamic_rotate %284 by %c4_i32 dim 0 : vector<16x64xf32>, i32 -> vector<16x64xf32>
    %cst_119 = arith.constant 4.000000e+00 : f32
    %316 = vector.broadcast %cst_119 : f32 to vector<16x64xf32>
    %317 = arith.cmpf oge, %5, %316 : vector<16x64xf32>
    %cst_120 = arith.constant 0.000000e+00 : f32
    %318 = vector.broadcast %cst_120 : f32 to vector<16x64xf32>
    %319 = arith.select %317, %315, %318 : vector<16x64xi1>, vector<16x64xf32>
    %320 = vector.extract_strided_slice %0 {offsets = [20, 0], sizes = [1, 64], strides = [1, 1]} : vector<25x64xf32> to vector<1x64xf32>
    %321 = vector.broadcast %320 : vector<1x64xf32> to vector<16x64xf32>
    %322 = arith.mulf %319, %321 : vector<16x64xf32>
    %323 = arith.addf %314, %322 : vector<16x64xf32>
    %c5_i32 = arith.constant 5 : i32
    %324 = tpu.dynamic_rotate %284 by %c5_i32 dim 0 : vector<16x64xf32>, i32 -> vector<16x64xf32>
    %cst_121 = arith.constant 5.000000e+00 : f32
    %325 = vector.broadcast %cst_121 : f32 to vector<16x64xf32>
    %326 = arith.cmpf oge, %5, %325 : vector<16x64xf32>
    %cst_122 = arith.constant 0.000000e+00 : f32
    %327 = vector.broadcast %cst_122 : f32 to vector<16x64xf32>
    %328 = arith.select %326, %324, %327 : vector<16x64xi1>, vector<16x64xf32>
    %329 = vector.extract_strided_slice %0 {offsets = [19, 0], sizes = [1, 64], strides = [1, 1]} : vector<25x64xf32> to vector<1x64xf32>
    %330 = vector.broadcast %329 : vector<1x64xf32> to vector<16x64xf32>
    %331 = arith.mulf %328, %330 : vector<16x64xf32>
    %332 = arith.addf %323, %331 : vector<16x64xf32>
    %c6_i32 = arith.constant 6 : i32
    %333 = tpu.dynamic_rotate %284 by %c6_i32 dim 0 : vector<16x64xf32>, i32 -> vector<16x64xf32>
    %cst_123 = arith.constant 6.000000e+00 : f32
    %334 = vector.broadcast %cst_123 : f32 to vector<16x64xf32>
    %335 = arith.cmpf oge, %5, %334 : vector<16x64xf32>
    %cst_124 = arith.constant 0.000000e+00 : f32
    %336 = vector.broadcast %cst_124 : f32 to vector<16x64xf32>
    %337 = arith.select %335, %333, %336 : vector<16x64xi1>, vector<16x64xf32>
    %338 = vector.extract_strided_slice %0 {offsets = [18, 0], sizes = [1, 64], strides = [1, 1]} : vector<25x64xf32> to vector<1x64xf32>
    %339 = vector.broadcast %338 : vector<1x64xf32> to vector<16x64xf32>
    %340 = arith.mulf %337, %339 : vector<16x64xf32>
    %341 = arith.addf %332, %340 : vector<16x64xf32>
    %342 = vector.extract_strided_slice %0 {offsets = [15, 0], sizes = [1, 64], strides = [1, 1]} : vector<25x64xf32> to vector<1x64xf32>
    %343 = vector.broadcast %342 : vector<1x64xf32> to vector<16x64xf32>
    %344 = arith.mulf %341, %343 : vector<16x64xf32>
    %345 = vector.extract_strided_slice %0 {offsets = [16, 0], sizes = [1, 64], strides = [1, 1]} : vector<25x64xf32> to vector<1x64xf32>
    %346 = vector.broadcast %345 : vector<1x64xf32> to vector<16x64xf32>
    %347 = arith.addf %344, %346 : vector<16x64xf32>
    %348 = arith.negf %347 : vector<16x64xf32>
    %349 = math.exp %348 : vector<16x64xf32>
    %cst_125 = arith.constant 1.000000e+00 : f32
    %350 = vector.broadcast %cst_125 : f32 to vector<16x64xf32>
    %351 = arith.addf %350, %349 : vector<16x64xf32>
    %352 = arith.divf %350, %351 : vector<16x64xf32>
    %353 = arith.mulf %347, %352 : vector<16x64xf32>
    %c8_126 = arith.constant 8 : index
    %c0_127 = arith.constant 0 : index
    %c0_128 = arith.constant 0 : index
    %354 = vector.load %arg1[%c8_126, %c0_127, %c0_128] : memref<9x64x64xf32, #tpu.memory_space<vmem>>, vector<1x64x64xf32>
    %355 = vector.shape_cast %354 : vector<1x64x64xf32> to vector<64x64xf32>
    %cst_129 = arith.constant dense<0.000000e+00> : vector<16x64xf32>
    %356 = tpu.matmul %353, %355, %cst_129 {dimension_numbers = #tpu.dot_dimension_numbers<[1], [0], [0], [1], [0, 0, 1, 1], [], []>} : vector<16x64xf32>, vector<64x64xf32>, vector<16x64xf32> -> vector<16x64xf32>
    %357 = arith.addf %253, %356 : vector<16x64xf32>
    %358 = vector.extract_strided_slice %0 {offsets = [17, 0], sizes = [1, 64], strides = [1, 1]} : vector<25x64xf32> to vector<1x64xf32>
    %359 = vector.broadcast %358 : vector<1x64xf32> to vector<16x64xf32>
    %360 = arith.addf %357, %359 : vector<16x64xf32>
    %361 = vector.extract_strided_slice %0 {offsets = [3, 0], sizes = [1, 64], strides = [1, 1]} : vector<25x64xf32> to vector<1x64xf32>
    %c2_130 = arith.constant 2 : index
    %c0_131 = arith.constant 0 : index
    %c0_132 = arith.constant 0 : index
    %362 = vector.load %arg2[%c2_130, %c0_131, %c0_132] : memref<4x64x128xf32, #tpu.memory_space<vmem>>, vector<1x64x128xf32>
    %363 = vector.shape_cast %362 : vector<1x64x128xf32> to vector<64x128xf32>
    %364 = vector.extract_strided_slice %1 {offsets = [2, 0], sizes = [1, 128], strides = [1, 1]} : vector<4x128xf32> to vector<1x128xf32>
    %c3_133 = arith.constant 3 : index
    %c0_134 = arith.constant 0 : index
    %c0_135 = arith.constant 0 : index
    %365 = vector.load %arg2[%c3_133, %c0_134, %c0_135] : memref<4x64x128xf32, #tpu.memory_space<vmem>>, vector<1x64x128xf32>
    %366 = vector.shape_cast %365 : vector<1x64x128xf32> to vector<64x128xf32>
    %367 = vector.extract_strided_slice %1 {offsets = [3, 0], sizes = [1, 128], strides = [1, 1]} : vector<4x128xf32> to vector<1x128xf32>
    %c1_136 = arith.constant 1 : index
    %c0_137 = arith.constant 0 : index
    %c0_138 = arith.constant 0 : index
    %368 = vector.load %arg3[%c1_136, %c0_137, %c0_138] : memref<2x128x64xf32, #tpu.memory_space<vmem>>, vector<1x128x64xf32>
    %369 = vector.shape_cast %368 : vector<1x128x64xf32> to vector<128x64xf32>
    %370 = vector.extract_strided_slice %0 {offsets = [6, 0], sizes = [1, 64], strides = [1, 1]} : vector<25x64xf32> to vector<1x64xf32>
    %371 = arith.mulf %360, %360 : vector<16x64xf32>
    %cst_139 = arith.constant dense<0.000000e+00> : vector<16xf32>
    %372 = vector.multi_reduction <add>, %371, %cst_139 [1] : vector<16x64xf32> to vector<16xf32>
    %373 = vector.shape_cast %372 : vector<16xf32> to vector<16x1xf32>
    %cst_140 = arith.constant 6.400000e+01 : f32
    %374 = vector.broadcast %cst_140 : f32 to vector<16x1xf32>
    %375 = arith.divf %373, %374 : vector<16x1xf32>
    %cst_141 = arith.constant 9.99999974E-6 : f32
    %376 = vector.broadcast %cst_141 : f32 to vector<16x1xf32>
    %377 = arith.addf %375, %376 : vector<16x1xf32>
    %378 = math.rsqrt %377 : vector<16x1xf32>
    %379 = vector.broadcast %378 : vector<16x1xf32> to vector<16x64xf32>
    %380 = arith.mulf %360, %379 : vector<16x64xf32>
    %381 = vector.broadcast %361 : vector<1x64xf32> to vector<16x64xf32>
    %382 = arith.mulf %380, %381 : vector<16x64xf32>
    %cst_142 = arith.constant dense<0.000000e+00> : vector<16x128xf32>
    %383 = tpu.matmul %382, %363, %cst_142 {dimension_numbers = #tpu.dot_dimension_numbers<[1], [0], [0], [1], [0, 0, 1, 1], [], []>} : vector<16x64xf32>, vector<64x128xf32>, vector<16x128xf32> -> vector<16x128xf32>
    %384 = vector.broadcast %364 : vector<1x128xf32> to vector<16x128xf32>
    %385 = arith.addf %383, %384 : vector<16x128xf32>
    %386 = arith.negf %385 : vector<16x128xf32>
    %387 = math.exp %386 : vector<16x128xf32>
    %cst_143 = arith.constant 1.000000e+00 : f32
    %388 = vector.broadcast %cst_143 : f32 to vector<16x128xf32>
    %389 = arith.addf %388, %387 : vector<16x128xf32>
    %390 = arith.divf %388, %389 : vector<16x128xf32>
    %391 = arith.mulf %385, %390 : vector<16x128xf32>
    %cst_144 = arith.constant dense<0.000000e+00> : vector<16x128xf32>
    %392 = tpu.matmul %382, %366, %cst_144 {dimension_numbers = #tpu.dot_dimension_numbers<[1], [0], [0], [1], [0, 0, 1, 1], [], []>} : vector<16x64xf32>, vector<64x128xf32>, vector<16x128xf32> -> vector<16x128xf32>
    %393 = vector.broadcast %367 : vector<1x128xf32> to vector<16x128xf32>
    %394 = arith.addf %392, %393 : vector<16x128xf32>
    %395 = arith.mulf %391, %394 : vector<16x128xf32>
    %cst_145 = arith.constant dense<0.000000e+00> : vector<16x64xf32>
    %396 = tpu.matmul %395, %369, %cst_145 {dimension_numbers = #tpu.dot_dimension_numbers<[1], [0], [0], [1], [0, 0, 1, 1], [], []>} : vector<16x128xf32>, vector<128x64xf32>, vector<16x64xf32> -> vector<16x64xf32>
    %397 = vector.broadcast %370 : vector<1x64xf32> to vector<16x64xf32>
    %398 = arith.addf %396, %397 : vector<16x64xf32>
    %cst_146 = arith.constant 5.000000e-01 : f32
    %399 = vector.broadcast %cst_146 : f32 to vector<16x64xf32>
    %400 = arith.mulf %399, %398 : vector<16x64xf32>
    %401 = arith.addf %360, %400 : vector<16x64xf32>
    %402 = vector.extract_strided_slice %0 {offsets = [4, 0], sizes = [1, 64], strides = [1, 1]} : vector<25x64xf32> to vector<1x64xf32>
    %403 = arith.mulf %401, %401 : vector<16x64xf32>
    %cst_147 = arith.constant dense<0.000000e+00> : vector<16xf32>
    %404 = vector.multi_reduction <add>, %403, %cst_147 [1] : vector<16x64xf32> to vector<16xf32>
    %405 = vector.shape_cast %404 : vector<16xf32> to vector<16x1xf32>
    %cst_148 = arith.constant 6.400000e+01 : f32
    %406 = vector.broadcast %cst_148 : f32 to vector<16x1xf32>
    %407 = arith.divf %405, %406 : vector<16x1xf32>
    %cst_149 = arith.constant 9.99999974E-6 : f32
    %408 = vector.broadcast %cst_149 : f32 to vector<16x1xf32>
    %409 = arith.addf %407, %408 : vector<16x1xf32>
    %410 = math.rsqrt %409 : vector<16x1xf32>
    %411 = vector.broadcast %410 : vector<16x1xf32> to vector<16x64xf32>
    %412 = arith.mulf %401, %411 : vector<16x64xf32>
    %413 = vector.broadcast %402 : vector<1x64xf32> to vector<16x64xf32>
    %414 = arith.mulf %412, %413 : vector<16x64xf32>
    %c0_150 = arith.constant 0 : index
    %c0_151 = arith.constant 0 : index
    %415 = vector.load %arg6[%c0_150, %c0_151] : memref<16x64xf32, #tpu.memory_space<vmem>>, vector<16x64xf32>
    tpu.vector_store %arg6[%c0_150, %c0_151], %414 {strides = array<i32>} : memref<16x64xf32, #tpu.memory_space<vmem>>, vector<16x64xf32>,
    return
  }
}

</mosaic_0001>

<bundles_post_ra>
// kernel: conformer_layer_forward.1
= control target key start
LH: loop header
LB: loop body
LE: loop exit
PB: predicated region body
PF: predicated region fallthrough
CT: control target
= control target key end

     0   :  { %vm5194_vm0 = vcmask 523264   ;;  %s5187_s0 = inlined_call_operand.vmem [shape: f32[64,64], index: 0, kind: input, shape index: {}]   ;;  %s5188_s1 = inlined_call_operand.vmem [shape: f32[9,64,64], index: 1, kind: input, shape index: {}]   ;;  %s5189_s2 = inlined_call_operand.vmem [shape: f32[4,64,128], index: 2, kind: input, shape index: {}]   ;;  %s5190_s3 = inlined_call_operand.vmem [shape: f32[2,128,64], index: 3, kind: input, shape index: {}]   ;;  %s5191_s4 = inlined_call_operand.vmem [shape: f32[25,64], index: 4, kind: input, shape index: {}]   ;;  %s5192_s5 = inlined_call_operand.vmem [shape: f32[4,128], index: 5, kind: input, shape index: {}]   ;;  %s5193_s6 = inlined_call_operand.hbm [shape: f32[16,64], index: 6, kind: output, shape index: {}]  }
   0x1   :  { %v4306_v0 = vld [vmem:[%s5187_s0] sm:$0xff]  ;;  %v4311_v1 = vld [vmem:[%s5187_s0 + $0x8] sm:$0xff] }
   0x2   :  { %11 = vsyncpa [#allocation4], 0  ;;  %v70_v2 = vmul.f32 %v4306_v0, %v4306_v0  ;;  %v71_v3 = vmul.f32 %v4311_v1, %v4311_v1  ;;  %v37_v6 = vld [vmem:[%s5189_s2] sm:$0xff]  ;;  %v38_v7 = vld [vmem:[%s5189_s2 + $0x8] sm:$0xff]  ;;  %v88_v23 = vlaneseq  ;;  %vm4258_vm1 = vmmov 0   ;;  %s4259_s15 = smov 112  }
   0x3   :  { %v3863_v8 = vpack.c.bf16 %v38_v7, %v37_v6  ;;  %v39_v9 = vld [vmem:[%s5189_s2 + $0x10] sm:$0xff]  ;;  %v40_v10 = vld [vmem:[%s5189_s2 + $0x18] sm:$0xff]  ;;  %v41_v12 = vld [vmem:[%s5189_s2 + $0x20] sm:$0xff]  ;;  %vm836_vm2 = vcmask 130048   ;;  %s4260_s16 = smov 96   ;;  %vm914_vm3 = vcmask 64512  }
   0x4   :  { %v73_v4 = vsel %vm5194_vm0, %v70_v2, 0.0  ;;  %v76_v5 = vsel %vm5194_vm0, %v71_v3, 0.0  ;;  %v3867_v11 = vpack.c.bf16 %v40_v10, %v39_v9  ;;  %v42_v13 = vld [vmem:[%s5189_s2 + $0x28] sm:$0xff]  ;;  %v43_v15 = vld [vmem:[%s5189_s2 + $0x30] sm:$0xff]  ;;  %v44_v16 = vld [vmem:[%s5189_s2 + $0x38] sm:$0xff]  ;;  %v4349_v27 = vshrl.u32 %v88_v23, 7 }
   0x5   :  { %74 = vadd.xlane.f32.xlu0 %v73_v4  ;;  %3864 = vmatprep.subr.bf16.mxu1 %v3863_v8  ;;  %v3871_v14 = vpack.c.bf16 %v42_v13, %v41_v12  ;;  %v3875_v17 = vpack.c.bf16 %v44_v16, %v43_v15  ;;  %v3105_v18 = vld [vmem:[%s5189_s2 + $0x40] sm:$0xff]  ;;  %v3106_v19 = vld [vmem:[%s5189_s2 + $0x48] sm:$0xff]  ;;  %v3107_v36 = vld [vmem:[%s5189_s2 + $0x50] sm:$0xff]  ;;  %s4261_s17 = smov 80   ;;  %s4262_s18 = smov 16   ;;  %vm1171_vm4 = vcmask 261248  }
   0x6   :  { %3866 = vmatpush3.bf16.msra.mxu1 %v3863_v8  ;;  %v3879_v20 = vpack.c.bf16 %v3106_v19, %v3105_v18  ;;  %v4352_v29 = vsub.s32 0, %v4349_v27  ;;  %v4357_v30 = vld [vmem:[%s5191_s4] sm:$0xff]  ;;  %v3108_v37 = vld [vmem:[%s5189_s2 + $0x58] sm:$0xff]  ;;  %v3110_v42 = vld [vmem:[%s5189_s2 + $0x68] sm:$0xff]  ;;  %v4438_v23 = vsub.s32 1, %v4349_v27  ;;  %s4263_s23 = smov 32  }
   0x7   :  { %3868 = vmatprep.subr.bf16.mxu1 %v3867_v11  ;;  %v3883_v40 = vpack.c.bf16 %v3108_v37, %v3107_v36  ;;  %v3109_v41 = vld [vmem:[%s5189_s2 + $0x60] sm:$0xff]  ;;  %v3111_v44 = vld [vmem:[%s5189_s2 + $0x70] sm:$0xff]  ;;  %v3112_v45 = vld [vmem:[%s5189_s2 + $0x78] sm:$0xff]  ;;  %v4442_v36 = vsub.s32 5, %v4349_v27  ;;  %s4264_s28 = smov 48   ;;  %vm1343_vm5 = vcmask 392448  }
   0x8   :  { %v91_v31 = vrot.slane %v4357_v30, %v4352_v29  ;;  %v3887_v43 = vpack.c.bf16 %v3110_v42, %v3109_v41  ;;  %v3891_v46 = vpack.c.bf16 %v3112_v45, %v3111_v44  ;;  %v54_v47 = vld [vmem:[%s5190_s3] sm:$0xff]  ;;  %v55_v48 = vld [vmem:[%s5190_s3 + $0x8] sm:$0xff]  ;;  %v56_v50 = vld [vmem:[%s5190_s3 + $0x10] sm:$0xff]  ;;  %vm1515_vm6 = vcmask 523648  }
   0x9   :  { %77 = vadd.xlane.f32.xlu0 %v76_v5  ;;  %v3895_v49 = vpack.c.bf16 %v55_v48, %v54_v47  ;;  %v57_v51 = vld [vmem:[%s5190_s3 + $0x18] sm:$0xff]  ;;  %v58_v53 = vld [vmem:[%s5190_s3 + $0x20] sm:$0xff]  ;;  %v59_v54 = vld [vmem:[%s5190_s3 + $0x28] sm:$0xff]  ;;  %v277_v37 = vrot.slane %v4357_v30, %v4442_v36  ;;  %vm2521_vm7 = vcmp.lt.s32.totalorder %v4349_v27, 1  ;;  %vm2538_vm10 = vcmp.lt.s32.totalorder %v4349_v27, 2 }
   0xa   :  { %3870 = vmatpush3.bf16.msra.mxu1 %v3867_v11  ;;  %v3899_v52 = vpack.c.bf16 %v57_v51, %v56_v50  ;;  %v3903_v55 = vpack.c.bf16 %v59_v54, %v58_v53  ;;  %v60_v56 = vld [vmem:[%s5190_s3 + $0x30] sm:$0xff]  ;;  %v61_v57 = vld [vmem:[%s5190_s3 + $0x38] sm:$0xff]  ;;  %v62_v59 = vld [vmem:[%s5190_s3 + $0x40] sm:$0xff]  ;;  %vm2555_vm11 = vcmp.lt.s32.totalorder %v4349_v27, 3  ;;  %vm2572_vm14 = vcmp.lt.s32.totalorder %v4349_v27, 4 }
   0xb   :  { %3872 = vmatprep.subr.bf16.mxu1 %v3871_v14  ;;  %3896 = vmatprep.subr.bf16.mxu0 %v3895_v49  ;;  %v3907_v58 = vpack.c.bf16 %v61_v57, %v60_v56  ;;  %v63_v60 = vld [vmem:[%s5190_s3 + $0x48] sm:$0xff]  ;;  %v64_v62 = vld [vmem:[%s5190_s3 + $0x50] sm:$0xff]  ;;  %v65_v63 = vld [vmem:[%s5190_s3 + $0x58] sm:$0xff] }
   0xc   :  { %3898 = vmatpush3.bf16.msra.mxu0 %v3895_v49  ;;  %v3911_v61 = vpack.c.bf16 %v63_v60, %v62_v59  ;;  %v3915_v2 = vpack.c.bf16 %v65_v63, %v64_v62  ;;  %v66_v3 = vld [vmem:[%s5190_s3 + $0x60] sm:$0xff]  ;;  %v67_v4 = vld [vmem:[%s5190_s3 + $0x68] sm:$0xff]  ;;  %v68_v6 = vld [vmem:[%s5190_s3 + $0x70] sm:$0xff] }
   0xd   :  { %3900 = vmatprep.subr.bf16.mxu0 %v3899_v52  ;;  %v3919_v5 = vpack.c.bf16 %v67_v4, %v66_v3  ;;  %v69_v7 = vld [vmem:[%s5190_s3 + $0x78] sm:$0xff]  ;;  %v28_v9 = vld [vmem:[%s5192_s5] sm:$0xf]  ;;  %v381_v54 = vld [vmem:[%s5188_s1 + $0x10] sm:$0xff] }
   0xe   :  { %3874 = vmatpush3.bf16.msra.mxu1 %v3871_v14  ;;  %v3923_v8 = vpack.c.bf16 %v69_v7, %v68_v6  ;;  %v97_v10 = vrot.slane %v28_v9, %v4352_v29  ;;  %v3131_v50 = vld [vmem:[%s5188_s1 + $0x80] sm:$0xff]  ;;  %v3133_v56 = vld [vmem:[%s5188_s1 + $0x90] sm:$0xff] }
   0xf   :  { %3876 = vmatprep.subr.bf16.mxu1 %v3875_v17  ;;  %v383_v60 = vld [vmem:[%s5188_s1 + $0x20] sm:$0xff]  ;;  %v385_v4 = vld [vmem:[%s5188_s1 + $0x30] sm:$0xff] }
  0x10   :  { %3902 = vmatpush3.bf16.msra.mxu0 %v3899_v52  ;;  %v3132_v52 = vld [vmem:[%s5188_s1 + $0x88] sm:$0xff]  ;;  %v3135_v62 = vld [vmem:[%s5188_s1 + $0xa0] sm:$0xff]  ;;  %v3137_v6 = vld [vmem:[%s5188_s1 + $0xb0] sm:$0xff] }
  0x11   :  { %3904 = vmatprep.subr.bf16.mxu0 %v3903_v55  ;;  %v3959_v53 = vpack.c.bf16 %v3132_v52, %v3131_v50  ;;  %v3141_v52 = vld [vmem:[%s5188_s1 + $0xc0] sm:$0xff] }
  0x12   :  { %3878 = vmatpush3.bf16.msra.mxu1 %v3875_v17 }
  0x13   :  { %3880 = vmatprep.subr.bf16.mxu1 %v3879_v20 }
  0x14   :  { %3906 = vmatpush3.bf16.msra.mxu0 %v3903_v55  ;;  %v382_v55 = vld [vmem:[%s5188_s1 + $0x18] sm:$0xff] }
  0x15   :  { %3908 = vmatprep.subr.bf16.mxu0 %v3907_v58  ;;  %v3931_v57 = vpack.c.bf16 %v382_v55, %v381_v54  ;;  %v3143_v55 = vld [vmem:[%s5188_s1 + $0xd0] sm:$0xff] }
  0x18   :  { %3910 = vmatpush3.bf16.msra.mxu0 %v3907_v58  ;;  %v3134_v58 = vld [vmem:[%s5188_s1 + $0x98] sm:$0xff] }
  0x19   :  { %3912 = vmatprep.subr.bf16.mxu0 %v3911_v61  ;;  %v3963_v59 = vpack.c.bf16 %v3134_v58, %v3133_v56  ;;  %v3144_v56 = vld [vmem:[%s5188_s1 + $0xd8] sm:$0xff]  ;;  %v3145_v58 = vld [vmem:[%s5188_s1 + $0xe0] sm:$0xff] }
  0x1c   :  { %3914 = vmatpush3.bf16.msra.mxu0 %v3911_v61  ;;  %v384_v61 = vld [vmem:[%s5188_s1 + $0x28] sm:$0xff] }
  0x1d   :  { %3916 = vmatprep.subr.bf16.mxu0 %v3915_v2  ;;  %v3935_v63 = vpack.c.bf16 %v384_v61, %v383_v60  ;;  %v3147_v61 = vld [vmem:[%s5188_s1 + $0xf0] sm:$0xff] }
  0x20   :  { %3918 = vmatpush3.bf16.msra.mxu0 %v3915_v2  ;;  %v3136_v2 = vld [vmem:[%s5188_s1 + $0xa8] sm:$0xff] }
  0x21   :  { %3920 = vmatprep.subr.bf16.mxu0 %v3919_v5  ;;  %v3967_v3 = vpack.c.bf16 %v3136_v2, %v3135_v62  ;;  %v3148_v62 = vld [vmem:[%s5188_s1 + $0xf8] sm:$0xff]  ;;  %v4257_v2 = vmov 0.0  }
  0x24   :  { %3922 = vmatpush3.bf16.msra.mxu0 %v3919_v5  ;;  %v386_v5 = vld [vmem:[%s5188_s1 + $0x38] sm:$0xff] }
  0x25   :  { %3924 = vmatprep.subr.bf16.mxu0 %v3923_v8  ;;  %v3939_v7 = vpack.c.bf16 %v386_v5, %v385_v4  ;;  %v4604_v4 = vld [vmem:[%s5191_s4 + $0x8] sm:$0xff] }
  0x28   :  { %3926 = vmatpush3.bf16.msra.mxu0 %v3923_v8  ;;  %v3138_v8 = vld [vmem:[%s5188_s1 + $0xb8] sm:$0xff] }
  0x29   :  { %3960 = vmatprep.subr.bf16.mxu0 %v3959_v53 }
  0x92   :  { %v75_v21 = vpop.xlane.xlu0 %74 }
  0x93   :  { %v80_v22 = vmul.f32 0.015625, %v75_v21 }
  0x95   :  { %v82_v24 = vadd.f32 1e-05, %v80_v22 }
  0x96   :  { %v78_v25 = vpop.xlane.xlu0 %77 }
  0x97   :  { %4146 = vrsqrt.f32 %v82_v24  ;;  %v81_v26 = vmul.f32 0.015625, %v78_v25  ;;  %v196_v24 = vrot.slane %v28_v9, %v4438_v23  ;;  %v3971_v9 = vpack.c.bf16 %v3138_v8, %v3137_v6 }
  0x98   :  { %v572_v6 = vrot.slane %v4604_v4, %v4438_v23 }
  0x99   :  { %v83_v28 = vadd.f32 1e-05, %v81_v26 }
  0x9b   :  { %4148 = vrsqrt.f32 %v83_v28 }
  0xa1   :  { %v4147_v32 = vpop.eup %4146 }
  0xa2   :  { %v86_v33 = vmul.f32 %v4147_v32, %v4306_v0 }
  0xa4   :  { %v92_v34 = vmul.f32 %v91_v31, %v86_v33 }
  0xa5   :  { %v4149_v35 = vpop.eup %4148 }
  0xa6   :  { %v87_v38 = vmul.f32 %v4149_v35, %v4311_v1  ;;  %3482 = vmatprep.mubr.msk.f32.mxu1 %vm5194_vm0, %v92_v34 }
  0xa8   :  { %v93_v39 = vmul.f32 %v91_v31, %v87_v38 }
  0xaa   :  { %3483 = vmatmul.mubr.msk.f32.vlgmr.msra.gmra.mrb[0].mxu1 %vm5194_vm0, %v93_v39 }
  0xab   :  { %3882 = vmatpush3.bf16.msra.mxu1 %v3879_v20  ;;  %3501 = vmatprep.mubr.msk.f32.mxu1 %vm5194_vm0, %v92_v34 }
  0xac   :  { %3884 = vmatprep.subr.bf16.mxu1 %v3883_v40 }
  0xaf   :  { %3886 = vmatpush3.bf16.msra.mxu1 %v3883_v40 }
  0xb0   :  { %3888 = vmatprep.subr.bf16.mxu1 %v3887_v43 }
  0xb3   :  { %3890 = vmatpush3.bf16.msra.mxu1 %v3887_v43 }
  0xb4   :  { %3892 = vmatprep.subr.bf16.mxu1 %v3891_v46 }
  0xb7   :  { %3894 = vmatpush3.bf16.msra.mxu1 %v3891_v46 }
  0xba   :  { %3502 = vmatmul.mubr.msk.f32.vlgmr.msra.gmra.mrb[2].mxu1 %vm5194_vm0, %v93_v39 }
 0x17d   :  { %v3484_v11 = vpop.f32.mrb[0].mxu1 }
 0x17e   :  { %v176_v12 = vadd.f32 %v3484_v11, %v97_v10  ;;  %v170_v13 = vpop.f32.mrb[1].mxu1  ;;  %v3122_v11 = vld [vmem:[%s5188_s1 + $0x48] sm:$0xff] }
 0x17f   :  { %v171_v14 = vadd.f32 %v170_v13, %v97_v10  ;;  %v3121_v10 = vld [vmem:[%s5188_s1 + $0x40] sm:$0xff] }
 0x180   :  { %v3116_v15 = vmul.f32 -1.442695, %v176_v12  ;;  %v3943_v13 = vpack.c.bf16 %v3122_v11, %v3121_v10 }
 0x181   :  { %v3115_v16 = vmul.f32 -1.442695, %v171_v14 }
 0x182   :  { %4150 = vpow2.f32 %v3116_v15 }
 0x183   :  { %4152 = vpow2.f32 %v3115_v16 }
 0x18c   :  { %v4151_v17 = vpop.eup %4150 }
 0x18d   :  { %v4153_v18 = vpop.eup %4152  ;;  %v186_v19 = vadd.f32 1.0, %v4151_v17  ;;  %v3503_v20 = vpop.f32.mrb[2].mxu1 }
 0x18e   :  { %v185_v21 = vadd.f32 1.0, %v4153_v18  ;;  %v263_v22 = vpop.f32.mrb[3].mxu1  ;;  %v269_v31 = vadd.f32 %v3503_v20, %v196_v24 }
 0x18f   :  { %4154 = vrcp.f32 %v186_v19  ;;  %v264_v32 = vadd.f32 %v263_v22, %v196_v24  ;;  %v376_v22 = vrot.slane %v4357_v30, %v4438_v23 }
 0x190   :  { %4156 = vrcp.f32 %v185_v21 }
 0x199   :  { %v4155_v25 = vpop.eup %4154 }
 0x19a   :  { %v4157_v26 = vpop.eup %4156  ;;  %v192_v28 = vmul.f32 %v4155_v25, %v176_v12  ;;  %v3151_v12 = vld [vmem:[%s5188_s1 + $0x100] sm:$0xff] }
 0x19b   :  { %v191_v33 = vmul.f32 %v4157_v26, %v171_v14  ;;  %v3152_v14 = vld [vmem:[%s5188_s1 + $0x108] sm:$0xff] }
 0x19c   :  { %v273_v34 = vmul.f32 %v269_v31, %v192_v28  ;;  %v3991_v15 = vpack.c.bf16 %v3152_v14, %v3151_v12  ;;  %v3123_v31 = vld [vmem:[%s5188_s1 + $0x50] sm:$0xff] }
 0x19d   :  { %v272_v35 = vmul.f32 %v264_v32, %v191_v33  ;;  %v3124_v33 = vld [vmem:[%s5188_s1 + $0x58] sm:$0xff] }
 0x19f   :  { %3536 = vmatprep.mubr.f32.mxu0 %v272_v35  ;;  %v3154_v35 = vld [vmem:[%s5188_s1 + $0x118] sm:$0xff] }
 0x1a0   :  { %3537 = vmatmul.mubr.f32.vlgmr.msra.gmra.mrb[0].mxu0 %v273_v34  ;;  %v3153_v34 = vld [vmem:[%s5188_s1 + $0x110] sm:$0xff] }
 0x1a1   :  { %3962 = vmatpush3.bf16.msra.mxu0 %v3959_v53  ;;  %v3142_v53 = vld [vmem:[%s5188_s1 + $0xc8] sm:$0xff] }
 0x1a2   :  { %3964 = vmatprep.subr.bf16.mxu0 %v3963_v59  ;;  %v3975_v54 = vpack.c.bf16 %v3142_v53, %v3141_v52 }
 0x1a5   :  { %3966 = vmatpush3.bf16.msra.mxu0 %v3963_v59  ;;  %v3146_v59 = vld [vmem:[%s5188_s1 + $0xe8] sm:$0xff] }
 0x1a6   :  { %3968 = vmatprep.subr.bf16.mxu0 %v3967_v3  ;;  %v3983_v60 = vpack.c.bf16 %v3146_v59, %v3145_v58 }
 0x1a9   :  { %3970 = vmatpush3.bf16.msra.mxu0 %v3967_v3  ;;  %v4599_v3 = vsub.s32 7, %v4349_v27 }
 0x1aa   :  { %3972 = vmatprep.subr.bf16.mxu0 %v3971_v9 }
 0x1ab   :  { %v390_v5 = vrot.slane %v4357_v30, %v4599_v3  ;;  %v484_v30 = vrot.slane %v4604_v4, %v4352_v29 }
 0x1ad   :  { %3974 = vmatpush3.bf16.msra.mxu0 %v3971_v9 }
 0x1ae   :  { %3992 = vmatprep.subr.bf16.mxu0 %v3991_v15 }
 0x273   :  { %v3538_v38 = vpop.f32.mrb[0].mxu0 }
 0x274   :  { %v350_v39 = vadd.f32 %v3538_v38, %v277_v37  ;;  %v344_v40 = vpop.f32.mrb[1].mxu0  ;;  %v3125_v38 = vld [vmem:[%s5188_s1 + $0x60] sm:$0xff] }
 0x275   :  { %v345_v41 = vadd.f32 %v344_v40, %v277_v37  ;;  %v3995_v40 = vpack.c.bf16 %v3154_v35, %v3153_v34 }
 0x276   :  { %v354_v42 = vmul.f32 0.5, %v350_v39  ;;  %v3947_v39 = vpack.c.bf16 %v3124_v33, %v3123_v31 }
 0x277   :  { %v353_v43 = vmul.f32 0.5, %v345_v41  ;;  %v3126_v41 = vld [vmem:[%s5188_s1 + $0x68] sm:$0xff] }
 0x278   :  { %v4447_v44 = vadd.f32 %v354_v42, %v4311_v1  ;;  %v379_v1 = vld [vmem:[%s5188_s1] sm:$0xff] }
 0x279   :  { %v4450_v45 = vadd.f32 %v353_v43, %v4306_v0  ;;  %v380_v0 = vld [vmem:[%s5188_s1 + $0x8] sm:$0xff]  ;;  %v3155_v42 = vld [vmem:[%s5188_s1 + $0x120] sm:$0xff] }
 0x27a   :  { %v358_v48 = vmul.f32 %v4447_v44, %v4447_v44  ;;  %v3927_v51 = vpack.c.bf16 %v380_v0, %v379_v1  ;;  %v3156_v43 = vld [vmem:[%s5188_s1 + $0x128] sm:$0xff]  ;;  %v3157_v1 = vld [vmem:[%s5188_s1 + $0x130] sm:$0xff]  ;;  %v3158_v0 = vld [vmem:[%s5188_s1 + $0x138] sm:$0xff] }
 0x27b   :  { %v357_v46 = vmul.f32 %v4450_v45, %v4450_v45 }
 0x27c   :  { %v362_v49 = vsel %vm5194_vm0, %v358_v48, 0.0  ;;  %3928 = vmatprep.subr.bf16.mxu1 %v3927_v51  ;;  %v3127_v48 = vld [vmem:[%s5188_s1 + $0x70] sm:$0xff] }
 0x27d   :  { %v359_v47 = vsel %vm5194_vm0, %v357_v46, 0.0  ;;  %3930 = vmatpush3.bf16.msra.mxu1 %v3927_v51  ;;  %v3951_v46 = vpack.c.bf16 %v3126_v41, %v3125_v38  ;;  %v4003_v51 = vpack.c.bf16 %v3158_v0, %v3157_v1  ;;  %v4635_v38 = vsub.s32 2, %v4349_v27 }
 0x27e   :  { %360 = vadd.xlane.f32.xlu1 %v359_v47  ;;  %3932 = vmatprep.subr.bf16.mxu1 %v3931_v57  ;;  %v3999_v47 = vpack.c.bf16 %v3156_v43, %v3155_v42 }
 0x281   :  { %3934 = vmatpush3.bf16.msra.mxu1 %v3931_v57  ;;  %v3979_v57 = vpack.c.bf16 %v3144_v56, %v3143_v55 }
 0x282   :  { %363 = vadd.xlane.f32.xlu1 %v362_v49  ;;  %3936 = vmatprep.subr.bf16.mxu1 %v3935_v63  ;;  %v3128_v49 = vld [vmem:[%s5188_s1 + $0x78] sm:$0xff] }
 0x283   :  { %v3955_v50 = vpack.c.bf16 %v3128_v49, %v3127_v48 }
 0x285   :  { %3938 = vmatpush3.bf16.msra.mxu1 %v3935_v63  ;;  %v3987_v63 = vpack.c.bf16 %v3148_v62, %v3147_v61 }
 0x286   :  { %3940 = vmatprep.subr.bf16.mxu1 %v3939_v7 }
 0x289   :  { %3942 = vmatpush3.bf16.msra.mxu1 %v3939_v7  ;;  %v32_v7 = vld [vmem:[%s5187_s0 + $0x18] sm:$0xff] }
 0x28a   :  { %3944 = vmatprep.subr.bf16.mxu1 %v3943_v13 }
 0x30b   :  { %v361_v16 = vpop.xlane.xlu1 %360 }
 0x30c   :  { %v365_v17 = vmul.f32 0.015625, %v361_v16 }
 0x30e   :  { %v367_v18 = vadd.f32 1e-05, %v365_v17 }
 0x30f   :  { %v364_v19 = vpop.xlane.xlu1 %363 }
 0x310   :  { %4158 = vrsqrt.f32 %v367_v18  ;;  %v366_v20 = vmul.f32 0.015625, %v364_v19  ;;  %v34_v18 = vld [vmem:[%s5187_s0 + $0x28] sm:$0xff] }
 0x312   :  { %v368_v21 = vadd.f32 1e-05, %v366_v20 }
 0x314   :  { %4160 = vrsqrt.f32 %v368_v21  ;;  %v31_v21 = vld [vmem:[%s5187_s0 + $0x10] sm:$0xff] }
 0x31a   :  { %v4159_v24 = vpop.eup %4158 }
 0x31b   :  { %v371_v25 = vmul.f32 %v4159_v24, %v4450_v45 }
 0x31d   :  { %v377_v26 = vmul.f32 %v376_v22, %v371_v25  ;;  %v33_v25 = vld [vmem:[%s5187_s0 + $0x20] sm:$0xff] }
 0x31e   :  { %v4161_v28 = vpop.eup %4160 }
 0x31f   :  { %v372_v32 = vmul.f32 %v4161_v28, %v4447_v44  ;;  %3555 = vmatprep.mubr.msk.f32.mxu1 %vm5194_vm0, %v377_v26  ;;  %3593 = vmatprep.mubr.msk.f32.mxu0 %vm5194_vm0, %v377_v26 }
 0x321   :  { %v378_v37 = vmul.f32 %v376_v22, %v372_v32 }
 0x323   :  { %3556 = vmatmul.mubr.msk.f32.vlgmr.msra.gmra.mrb[4].mxu1 %vm5194_vm0, %v378_v37  ;;  %3594 = vmatmul.mubr.msk.f32.vlgmr.msra.gmra.mrb[2].mxu0 %vm5194_vm0, %v378_v37 }
 0x324   :  { %3946 = vmatpush3.bf16.msra.mxu1 %v3943_v13  ;;  %3994 = vmatpush3.bf16.msra.mxu0 %v3991_v15  ;;  %v4614_v15 = vsub.s32 3, %v4349_v27 }
 0x325   :  { %3574 = vmatprep.mubr.msk.f32.mxu1 %vm5194_vm0, %v377_v26  ;;  %3631 = vmatprep.mubr.msk.f32.mxu0 %vm5194_vm0, %v377_v26 }
 0x326   :  { %3948 = vmatprep.subr.bf16.mxu1 %v3947_v39  ;;  %3996 = vmatprep.subr.bf16.mxu0 %v3995_v40  ;;  %v748_v16 = vrot.slane %v4604_v4, %v4614_v15 }
 0x328   :  { %3950 = vmatpush3.bf16.msra.mxu1 %v3947_v39  ;;  %3998 = vmatpush3.bf16.msra.mxu0 %v3995_v40  ;;  %v660_v39 = vrot.slane %v4604_v4, %v4635_v38 }
 0x329   :  { %3952 = vmatprep.subr.bf16.mxu1 %v3951_v46  ;;  %4000 = vmatprep.subr.bf16.mxu0 %v3999_v47 }
 0x32c   :  { %3954 = vmatpush3.bf16.msra.mxu1 %v3951_v46  ;;  %4002 = vmatpush3.bf16.msra.mxu0 %v3999_v47 }
 0x32d   :  { %3956 = vmatprep.subr.bf16.mxu1 %v3955_v50  ;;  %4004 = vmatprep.subr.bf16.mxu0 %v4003_v51 }
 0x330   :  { %3958 = vmatpush3.bf16.msra.mxu1 %v3955_v50  ;;  %4006 = vmatpush3.bf16.msra.mxu0 %v4003_v51 }
 0x331   :  { %3976 = vmatprep.subr.bf16.mxu1 %v3975_v54  ;;  %3654 = vmatprep.subr.mxu0 %v4257_v2 }
 0x333   :  { %3575 = vmatmul.mubr.msk.f32.vlgmr.msra.gmra.mrb[6].mxu1 %vm5194_vm0, %v378_v37  ;;  %3632 = vmatmul.mubr.msk.f32.vlgmr.msra.gmra.mrb[4].mxu0 %vm5194_vm0, %v378_v37 }
 0x334   :  { %3978 = vmatpush3.bf16.msra.mxu1 %v3975_v54  ;;  %3612 = vmatprep.mubr.msk.f32.mxu1 %vm5194_vm0, %v377_v26 }
 0x335   :  { %3980 = vmatprep.subr.bf16.mxu1 %v3979_v57  ;;  %3656 = vmatprep.mubr.msk.f32.mxu0 %vm4258_vm1, %v4257_v2 }
 0x338   :  { %3982 = vmatpush3.bf16.msra.mxu1 %v3979_v57 }
 0x339   :  { %3984 = vmatprep.subr.bf16.mxu1 %v3983_v60 }
 0x33c   :  { %3986 = vmatpush3.bf16.msra.mxu1 %v3983_v60 }
 0x33d   :  { %3988 = vmatprep.subr.bf16.mxu1 %v3987_v63 }
 0x340   :  { %3990 = vmatpush3.bf16.msra.mxu1 %v3987_v63 }
 0x341   :  { %3634 = vmatprep.subr.mxu1 %v4257_v2 }
 0x343   :  { %3613 = vmatmul.mubr.msk.f32.vlgmr.msra.gmra.mrb[8].mxu1 %vm5194_vm0, %v378_v37 }
 0x344   :  { %3636 = vmatprep.mubr.msk.f32.mxu1 %vm4258_vm1, %v4257_v2 }
 0x3f6   :  { %v3557_v8 = vpop.f32.mrb[4].mxu1  ;;  %v3595_v9 = vpop.f32.mrb[2].mxu0 }
 0x3f7   :  { %v469_v10 = vadd.f32 %v3557_v8, %v390_v5  ;;  %v645_v11 = vadd.f32 %v3595_v9, %v572_v6  ;;  %v463_v12 = vpop.f32.mrb[5].mxu1  ;;  %v639_v13 = vpop.f32.mrb[3].mxu0 }
 0x3f8   :  { %v464_v17 = vadd.f32 %v463_v12, %v390_v5  ;;  %v640_v40 = vadd.f32 %v639_v13, %v572_v6 }
 0x3f9   :  { %v825_v14 = vmul.f32 %v469_v10, %v32_v7  ;;  %v831_v47 = vmul.f32 %v645_v11, %v32_v7 }
 0x3fa   :  { %v824_v33 = vmul.f32 %v464_v17, %v31_v21  ;;  %v830_v49 = vmul.f32 %v640_v40, %v31_v21 }
 0x406   :  { %v3576_v19 = vpop.f32.mrb[6].mxu1  ;;  %v3633_v20 = vpop.f32.mrb[4].mxu0 }
 0x407   :  { %v557_v22 = vadd.f32 %v3576_v19, %v484_v30  ;;  %v4626_v24 = vadd.f32 %v3633_v20, %v748_v16  ;;  %v551_v26 = vpop.f32.mrb[7].mxu1  ;;  %v815_v28 = vpop.f32.mrb[5].mxu0 }
 0x408   :  { %v552_v31 = vadd.f32 %v551_v26, %v484_v30  ;;  %v4642_v51 = vadd.f32 %v815_v28, %v748_v16 }
 0x409   :  { %v827_v32 = vmul.f32 %v557_v22, %v34_v18 }
 0x40a   :  { %v826_v34 = vmul.f32 %v552_v31, %v33_v25 }
 0x40b   :  { %v4631_v35 = vadd.f32 %v827_v32, %v825_v14 }
 0x40c   :  { %v828_v37 = vadd.f32 %v826_v34, %v824_v33 }
 0x40e   :  { %1000 = vrot.lane.b32.xlu1 %v828_v37, %s4259_s15 }
 0x416   :  { %v3614_v41 = vpop.f32.mrb[8].mxu1 }
 0x417   :  { %v733_v42 = vadd.f32 %v3614_v41, %v660_v39  ;;  %v727_v43 = vpop.f32.mrb[9].mxu1 }
 0x418   :  { %v728_v46 = vadd.f32 %v727_v43, %v660_v39 }
 0x419   :  { %v833_v48 = vmul.f32 %v733_v42, %v34_v18 }
 0x41a   :  { %v832_v1 = vmul.f32 %v728_v46, %v33_v25 }
 0x41b   :  { %v835_v0 = vadd.f32 %v833_v48, %v831_v47 }
 0x41c   :  { %v834_v50 = vadd.f32 %v832_v1, %v830_v49 }
 0x41e   :  { %3635 = vmatpush3.xpose.msk.msra.mxu1 %vm836_vm2, %v834_v50  ;;  %1175 = vrot.lane.b32.xlu1 %v834_v50, %s4260_s16 }
 0x41f   :  { %3639 = vmatprep.subr.mxu1 %v4257_v2 }
 0x421   :  { %3637 = vmatmul.mubr.msk.f32.vlgmr.msra.gmra.mrb[10].mxu1 %vm836_vm2, %v828_v37 }
 0x422   :  { %3640 = vmatpush3.msra.mxu1 %v4642_v51  ;;  %3641 = vmatprep.mubr.msk.f32.mxu1 %vm4258_vm1, %v4257_v2 }
 0x423   :  { %3644 = vmatprep.subr.mxu1 %v4257_v2 }
 0x480   :  { %v1001_v52 = vpop.permute.xlu1 %1000 }
 0x490   :  { %v1176_v53 = vpop.permute.xlu1 %1175 }
 0x491   :  { %3655 = vmatpush3.xpose.msk.msra.mxu0 %vm836_vm2, %v1176_v53 }
 0x492   :  { %3664 = vmatprep.subr.mxu0 %v4257_v2 }
 0x4f4   :  { %v909_v54 = vpop.f32.mrb[10].mxu1 }
 0x4f5   :  { %v913_v55 = vmul.f32 0.25, %v909_v54  ;;  %v3638_v56 = vpop.f32.mrb[11].mxu1 }
 0x4f7   :  { %v915_v57 = vsel %vm914_vm3, %v913_v55, -inf }
 0x4f8   :  { %916 = vmax.xlane.f32.xlu0 %v915_v57 }
 0x50e   :  { %1002 = vrot.lane.b32.xlu0 %v834_v50, %s4259_s15 }
 0x512   :  { %1347 = vrot.lane.b32.xlu0 %v834_v50, %s4261_s17 }
 0x516   :  { %1681 = vrot.lane.b32.xlu0 %v835_v0, %s4259_s15 }
 0x51a   :  { %1853 = vrot.lane.b32.xlu0 %v835_v0, %s4260_s16 }
 0x51e   :  { %2024 = vrot.lane.b32.xlu0 %v835_v0, %s4261_s17 }
 0x585   :  { %v917_v58 = vpop.xlane.xlu0 %916 }
 0x586   :  { %v918_v59 = vsub.f32 %v913_v55, %v917_v58 }
 0x588   :  { %v919_v60 = vmul.f32 1.442695, %v918_v59 }
 0x589   :  { %v1003_v63 = vpop.permute.xlu0 %1002 }
 0x58a   :  { %4162 = vpow2.f32 %v919_v60 }
 0x58d   :  { %v1348_v6 = vpop.permute.xlu0 %1347 }
 0x591   :  { %v1682_v9 = vpop.permute.xlu0 %1681 }
 0x594   :  { %v4163_v61 = vpop.eup %4162 }
 0x595   :  { %v921_v62 = vsel %vm914_vm3, %v4163_v61, 0.0  ;;  %v1854_v13 = vpop.permute.xlu0 %1853 }
 0x596   :  { %922 = vadd.xlane.f32.xlu1 %v921_v62 }
 0x599   :  { %v2025_v30 = vpop.permute.xlu0 %2024 }
 0x5a7   :  { %1173 = vrot.lane.b32.xlu1 %v828_v37, %s4260_s16 }
 0x5ab   :  { %1345 = vrot.lane.b32.xlu1 %v828_v37, %s4261_s17 }
 0x5af   :  { %1679 = vrot.lane.b32.xlu1 %v4631_v35, %s4259_s15 }
 0x5b3   :  { %1851 = vrot.lane.b32.xlu1 %v4631_v35, %s4260_s16 }
 0x5b7   :  { %2022 = vrot.lane.b32.xlu1 %v4631_v35, %s4261_s17 }
 0x623   :  { %v923_v5 = vpop.xlane.xlu1 %922 }
 0x624   :  { %4164 = vrcp.f32 %v923_v5 }
 0x627   :  { %v1174_v7 = vpop.permute.xlu1 %1173 }
 0x628   :  { %3657 = vmatmul.mubr.msk.f32.vlgmr.msra.gmra.mrb[6].mxu0 %vm836_vm2, %v1174_v7 }
 0x629   :  { %3665 = vmatpush3.xpose.msk.msra.mxu0 %vm836_vm2, %v1348_v6  ;;  %3666 = vmatprep.mubr.msk.f32.mxu0 %vm4258_vm1, %v4257_v2 }
 0x62a   :  { %3674 = vmatprep.subr.mxu0 %v4257_v2 }
 0x62b   :  { %v1346_v8 = vpop.permute.xlu1 %1345 }
 0x62c   :  { %3667 = vmatmul.mubr.msk.f32.vlgmr.msra.gmra.mrb[8].mxu0 %vm836_vm2, %v1346_v8 }
 0x62d   :  { %3675 = vmatpush3.xpose.msk.msra.mxu0 %vm836_vm2, %v835_v0  ;;  %3676 = vmatprep.mubr.msk.f32.mxu0 %vm4258_vm1, %v4257_v2 }
 0x62e   :  { %v4165_v10 = vpop.eup %4164  ;;  %3684 = vmatprep.subr.mxu0 %v4257_v2 }
 0x62f   :  { %v925_v11 = vmul.f32 %v4165_v10, %v4163_v61  ;;  %v1680_v12 = vpop.permute.xlu1 %1679 }
 0x630   :  { %3677 = vmatmul.mubr.msk.f32.vlgmr.msra.gmra.mrb[10].mxu0 %vm836_vm2, %v4631_v35 }
 0x631   :  { %3685 = vmatpush3.xpose.msk.msra.mxu0 %vm836_vm2, %v1682_v9  ;;  %3642 = vmatmul.mubr.msk.f32.vlgmr.msra.gmra.mrb[12].mxu1 %vm914_vm3, %v925_v11 }
 0x632   :  { %3645 = vmatpush3.xpose.msk.msra.mxu1 %vm836_vm2, %v1003_v63  ;;  %3686 = vmatprep.mubr.msk.f32.mxu0 %vm4258_vm1, %v4257_v2 }
 0x633   :  { %3694 = vmatprep.subr.mxu0 %v4257_v2  ;;  %3646 = vmatprep.mubr.msk.f32.mxu1 %vm4258_vm1, %v4257_v2  ;;  %v1852_v14 = vpop.permute.xlu1 %1851 }
 0x634   :  { %3687 = vmatmul.mubr.msk.f32.vlgmr.msra.gmra.mrb[12].mxu0 %vm836_vm2, %v1680_v12  ;;  %3649 = vmatprep.subr.mxu1 %v4257_v2 }
 0x635   :  { %3695 = vmatpush3.xpose.msk.msra.mxu0 %vm836_vm2, %v1854_v13  ;;  %3647 = vmatmul.mubr.msk.f32.vlgmr.msra.gmra.mrb[14].mxu1 %vm836_vm2, %v1001_v52 }
 0x636   :  { %3696 = vmatprep.mubr.msk.f32.mxu0 %vm4258_vm1, %v4257_v2  ;;  %3704 = vmatprep.subr.mxu0 %v4257_v2 }
 0x637   :  { %3651 = vmatprep.mubr.msk.f32.mxu1 %vm4258_vm1, %v4257_v2  ;;  %v2023_v16 = vpop.permute.xlu1 %2022 }
 0x638   :  { %3697 = vmatmul.mubr.msk.f32.vlgmr.msra.gmra.mrb[14].mxu0 %vm836_vm2, %v1852_v14 }
 0x639   :  { %3705 = vmatpush3.xpose.msk.msra.mxu0 %vm836_vm2, %v2025_v30  ;;  %3706 = vmatprep.mubr.msk.f32.mxu0 %vm4258_vm1, %v4257_v2 }
 0x63c   :  { %3707 = vmatmul.mubr.msk.f32.vlgmr.msra.gmra.mrb[16].mxu0 %vm836_vm2, %v2023_v16 }
 0x6fb   :  { %v1247_v17 = vpop.f32.mrb[6].mxu0 }
 0x6fc   :  { %v1251_v18 = vmul.f32 0.25, %v1247_v17  ;;  %v3658_v19 = vpop.f32.mrb[7].mxu0 }
 0x6fe   :  { %v1252_v20 = vsel %vm914_vm3, %v1251_v18, -inf }
 0x6ff   :  { %1253 = vmax.xlane.f32.xlu1 %v1252_v20  ;;  %v1419_v21 = vpop.f32.mrb[8].mxu0 }
 0x700   :  { %v3668_v22 = vpop.f32.mrb[9].mxu0  ;;  %v1423_v39 = vmul.f32 0.25, %v1419_v21 }
 0x702   :  { %v1424_v49 = vsel %vm914_vm3, %v1423_v39, -inf }
 0x703   :  { %v1589_v25 = vpop.f32.mrb[10].mxu0 }
 0x704   :  { %v995_v26 = vpop.f32.mrb[12].mxu1  ;;  %v3678_v28 = vpop.f32.mrb[11].mxu0  ;;  %v1593_v47 = vmul.f32 0.25, %v1589_v25 }
 0x705   :  { %999 = vst.msk [vmem:[#allocation2] sm:$0xff] %vm836_vm2, %v995_v26  ;;  %v3643_v31 = vpop.f32.mrb[13].mxu1 }
 0x706   :  { %v1594_v50 = vsel %vm914_vm3, %v1593_v47, -inf }
 0x707   :  { %v1753_v32 = vpop.f32.mrb[12].mxu0 }
 0x708   :  { %v1074_v33 = vpop.f32.mrb[14].mxu1  ;;  %v3688_v34 = vpop.f32.mrb[13].mxu0  ;;  %v1757_v0 = vmul.f32 0.25, %v1753_v32 }
 0x709   :  { %v4702_v35 = vmul.f32 0.25, %v1074_v33  ;;  %v3648_v37 = vpop.f32.mrb[15].mxu1 }
 0x70a   :  { %v1758_v53 = vsel %vm914_vm3, %v1757_v0, -inf }
 0x70b   :  { %v1925_v40 = vpop.f32.mrb[14].mxu0  ;;  %v1079_v41 = vsel %vm914_vm3, %v4702_v35, -inf }
 0x70c   :  { %v1929_v42 = vmul.f32 0.25, %v1925_v40  ;;  %v3698_v43 = vpop.f32.mrb[15].mxu0  ;;  %1080 = vmax.xlane.f32.xlu0 %v1079_v41 }
 0x70e   :  { %v1930_v46 = vsel %vm914_vm3, %v1929_v42, -inf }
 0x70f   :  { %1931 = vmax.xlane.f32.xlu1 %v1930_v46  ;;  %v2096_v48 = vpop.f32.mrb[16].mxu0 }
 0x710   :  { %v3708_v1 = vpop.f32.mrb[17].mxu0  ;;  %1425 = vmax.xlane.f32.xlu0 %v1424_v49  ;;  %v2100_v52 = vmul.f32 0.25, %v2096_v48 }
 0x712   :  { %v2101_v54 = vsel %vm914_vm3, %v2100_v52, -inf }
 0x714   :  { %1595 = vmax.xlane.f32.xlu0 %v1594_v50 }
 0x718   :  { %1759 = vmax.xlane.f32.xlu0 %v1758_v53 }
 0x71c   :  { %2102 = vmax.xlane.f32.xlu0 %v2101_v54 }
 0x78c   :  { %v1254_v55 = vpop.xlane.xlu1 %1253 }
 0x78d   :  { %v1255_v56 = vsub.f32 %v1251_v18, %v1254_v55 }
 0x78f   :  { %v1256_v57 = vmul.f32 1.442695, %v1255_v56 }
 0x791   :  { %4166 = vpow2.f32 %v1256_v57 }
 0x799   :  { %v1081_v58 = vpop.xlane.xlu0 %1080 }
 0x79a   :  { %v1082_v32 = vsub.f32 %v4702_v35, %v1081_v58 }
 0x79b   :  { %v4711_v59 = vpop.eup %4166 }
 0x79c   :  { %v1258_v60 = vsel %vm914_vm3, %v4711_v59, 0.0  ;;  %v1932_v61 = vpop.xlane.xlu1 %1931  ;;  %v1083_v33 = vmul.f32 1.442695, %v1082_v32 }
 0x79d   :  { %1259 = vadd.xlane.f32.xlu0 %v1258_v60  ;;  %v1426_v62 = vpop.xlane.xlu0 %1425  ;;  %v1933_v5 = vsub.f32 %v1929_v42, %v1932_v61 }
 0x79e   :  { %v1427_v63 = vsub.f32 %v1423_v39, %v1426_v62 }
 0x79f   :  { %v1934_v9 = vmul.f32 1.442695, %v1933_v5 }
 0x7a0   :  { %v1428_v6 = vmul.f32 1.442695, %v1427_v63 }
 0x7a1   :  { %v1596_v7 = vpop.xlane.xlu0 %1595 }
 0x7a2   :  { %4168 = vpow2.f32 %v1428_v6  ;;  %v1597_v8 = vsub.f32 %v1593_v47, %v1596_v7  ;;  %v3185_v7 = vld [vmem:[%s5188_s1 + $0x140] sm:$0xff] }
 0x7a4   :  { %v1598_v10 = vmul.f32 1.442695, %v1597_v8  ;;  %v3186_v8 = vld [vmem:[%s5188_s1 + $0x148] sm:$0xff] }
 0x7a5   :  { %v1760_v11 = vpop.xlane.xlu0 %1759 }
 0x7a6   :  { %4170 = vpow2.f32 %v1598_v10  ;;  %v1761_v12 = vsub.f32 %v1757_v0, %v1760_v11  ;;  %v3187_v11 = vld [vmem:[%s5188_s1 + $0x150] sm:$0xff] }
 0x7a7   :  { %4172 = vpow2.f32 %v1934_v9  ;;  %v4007_v9 = vpack.c.bf16 %v3186_v8, %v3185_v7  ;;  %v3199_v7 = vld [vmem:[%s5188_s1 + $0x1a0] sm:$0xff]  ;;  %v3200_v8 = vld [vmem:[%s5188_s1 + $0x1a8] sm:$0xff] }
 0x7a8   :  { %v1762_v13 = vmul.f32 1.442695, %v1761_v12  ;;  %v3188_v12 = vld [vmem:[%s5188_s1 + $0x158] sm:$0xff] }
 0x7a9   :  { %v2103_v14 = vpop.xlane.xlu0 %2102  ;;  %4008 = vmatprep.subr.bf16.mxu0 %v4007_v9 }
 0x7aa   :  { %4174 = vpow2.f32 %v1762_v13  ;;  %v2104_v30 = vsub.f32 %v2100_v52, %v2103_v14  ;;  %4010 = vmatpush3.bf16.msra.mxu0 %v4007_v9  ;;  %v4011_v13 = vpack.c.bf16 %v3188_v12, %v3187_v11  ;;  %v3209_v9 = vld [vmem:[%s5188_s1 + $0x1e0] sm:$0xff]  ;;  %v3201_v12 = vld [vmem:[%s5188_s1 + $0x1b0] sm:$0xff] }
 0x7ac   :  { %v4169_v16 = vpop.eup %4168  ;;  %v2105_v17 = vmul.f32 1.442695, %v2104_v30  ;;  %4012 = vmatprep.subr.bf16.mxu0 %v4011_v13 }
 0x7ad   :  { %v1430_v18 = vsel %vm914_vm3, %v4169_v16, 0.0 }
 0x7ae   :  { %4176 = vpow2.f32 %v2105_v17  ;;  %1431 = vadd.xlane.f32.xlu1 %v1430_v18  ;;  %4014 = vmatpush3.bf16.msra.mxu0 %v4011_v13  ;;  %v3190_v17 = vld [vmem:[%s5188_s1 + $0x168] sm:$0xff]  ;;  %v3202_v13 = vld [vmem:[%s5188_s1 + $0x1b8] sm:$0xff] }
 0x7af   :  { %4178 = vpow2.f32 %v1083_v33 }
 0x7b0   :  { %v4171_v19 = vpop.eup %4170 }
 0x7b1   :  { %v1600_v20 = vsel %vm914_vm3, %v4171_v19, 0.0  ;;  %v4717_v21 = vpop.eup %4172 }
 0x7b2   :  { %1601 = vadd.xlane.f32.xlu0 %v1600_v20  ;;  %v1936_v25 = vsel %vm914_vm3, %v4717_v21, 0.0  ;;  %v3191_v20 = vld [vmem:[%s5188_s1 + $0x170] sm:$0xff] }
 0x7b4   :  { %v4719_v22 = vpop.eup %4174 }
 0x7b5   :  { %v1764_v26 = vsel %vm914_vm3, %v4719_v22, 0.0 }
 0x7b6   :  { %1937 = vadd.xlane.f32.xlu0 %v1936_v25  ;;  %1765 = vadd.xlane.f32.xlu1 %v1764_v26 }
 0x7b8   :  { %v4725_v28 = vpop.eup %4176 }
 0x7b9   :  { %v2107_v31 = vsel %vm914_vm3, %v4725_v28, 0.0  ;;  %v4179_v34 = vpop.eup %4178 }
 0x7ba   :  { %2108 = vadd.xlane.f32.xlu1 %v2107_v31  ;;  %v1085_v37 = vsel %vm914_vm3, %v4179_v34, 0.0 }
 0x7cb   :  { %1263 = vrot.lane.b32.xlu1 %v4642_v51, %s4260_s16 }
 0x7cc   :  { %1091 = vrot.lane.b32.xlu0 %v4642_v51, %s4259_s15 }
 0x7d0   :  { %1941 = vrot.lane.b32.xlu0 %v4626_v24, %s4260_s16 }
 0x7ef   :  { %1086 = vadd.xlane.f32.xlu1 %v1085_v37 }
 0x800   :  { %1435 = vrot.lane.b32.xlu1 %v4642_v51, %s4261_s17 }
 0x804   :  { %1770 = vrot.lane.b32.xlu1 %v4626_v24, %s4259_s15 }
 0x808   :  { %2112 = vrot.lane.b32.xlu1 %v4626_v24, %s4261_s17 }
 0x82a   :  { %v1260_v39 = vpop.xlane.xlu0 %1259 }
 0x83b   :  { %v1432_v35 = vpop.xlane.xlu1 %1431 }
 0x83f   :  { %v1602_v40 = vpop.xlane.xlu0 %1601 }
 0x843   :  { %v1938_v41 = vpop.xlane.xlu0 %1937  ;;  %v1766_v43 = vpop.xlane.xlu1 %1765 }
 0x847   :  { %v1092_v42 = vpop.permute.xlu0 %1091  ;;  %v2109_v46 = vpop.xlane.xlu1 %2108 }
 0x848   :  { %3650 = vmatpush3.msra.mxu1 %v1092_v42 }
 0x849   :  { %3659 = vmatprep.subr.mxu1 %v4257_v2 }
 0x84b   :  { %v1264_v47 = vpop.permute.xlu1 %1263 }
 0x87c   :  { %v1087_v48 = vpop.xlane.xlu1 %1086 }
 0x87d   :  { %4180 = vrcp.f32 %v1087_v48 }
 0x87e   :  { %4182 = vrcp.f32 %v1260_v39 }
 0x87f   :  { %4184 = vrcp.f32 %v1432_v35 }
 0x880   :  { %4186 = vrcp.f32 %v1602_v40  ;;  %v1436_v52 = vpop.permute.xlu1 %1435 }
 0x881   :  { %4188 = vrcp.f32 %v1766_v43 }
 0x882   :  { %4190 = vrcp.f32 %v1938_v41 }
 0x883   :  { %4192 = vrcp.f32 %v2109_v46 }
 0x884   :  { %v1771_v57 = vpop.permute.xlu1 %1770 }
 0x887   :  { %v4181_v51 = vpop.eup %4180 }
 0x888   :  { %v1089_v49 = vmul.f32 %v4181_v51, %v4179_v34  ;;  %v4183_v1 = vpop.eup %4182  ;;  %v2113_v62 = vpop.permute.xlu1 %2112 }
 0x889   :  { %v1262_v0 = vmul.f32 %v4183_v1, %v4711_v59  ;;  %v4185_v50 = vpop.eup %4184 }
 0x88a   :  { %3652 = vmatmul.mubr.msk.f32.vlgmr.msra.gmra.mrb[16].mxu1 %vm914_vm3, %v1089_v49  ;;  %v1434_v53 = vmul.f32 %v4185_v50, %v4169_v16  ;;  %v4187_v54 = vpop.eup %4186  ;;  %v3189_v16 = vld [vmem:[%s5188_s1 + $0x160] sm:$0xff] }
 0x88b   :  { %3660 = vmatpush3.msra.mxu1 %v1264_v47  ;;  %3661 = vmatprep.mubr.msk.f32.mxu1 %vm4258_vm1, %v4257_v2  ;;  %v1604_v55 = vmul.f32 %v4187_v54, %v4171_v19  ;;  %v4189_v56 = vpop.eup %4188  ;;  %v4015_v18 = vpack.c.bf16 %v3190_v17, %v3189_v16  ;;  %v4805_v47 = vsub.s32 4, %v4349_v27  ;;  %v3212_v16 = vld [vmem:[%s5188_s1 + $0x1f8] sm:$0xff] }
 0x88c   :  { %3669 = vmatprep.subr.mxu1 %v4257_v2  ;;  %v1768_v58 = vmul.f32 %v4189_v56, %v4719_v22  ;;  %v4191_v59 = vpop.eup %4190 }
 0x88d   :  { %v1940_v60 = vmul.f32 %v4191_v59, %v4717_v21  ;;  %v4193_v61 = vpop.eup %4192  ;;  %v3192_v21 = vld [vmem:[%s5188_s1 + $0x178] sm:$0xff]  ;;  %4016 = vmatprep.subr.bf16.mxu0 %v4015_v18  ;;  %v2290_v48 = vrot.slane %v4604_v4, %v4805_v47  ;;  %v3206_v59 = vld [vmem:[%s5188_s1 + $0x1c8] sm:$0xff] }
 0x88e   :  { %3662 = vmatmul.mubr.msk.f32.vlgmr.msra.gmra.mrb[18].mxu1 %vm914_vm3, %v1262_v0  ;;  %v2111_v63 = vmul.f32 %v4193_v61, %v4725_v28  ;;  %v4019_v25 = vpack.c.bf16 %v3192_v21, %v3191_v20  ;;  %4018 = vmatpush3.bf16.msra.mxu0 %v4015_v18  ;;  %v3198_v61 = vld [vmem:[%s5188_s1 + $0x198] sm:$0xff] }
 0x88f   :  { %3670 = vmatpush3.msra.mxu1 %v1436_v52  ;;  %3671 = vmatprep.mubr.msk.f32.mxu1 %vm4258_vm1, %v4257_v2 }
 0x890   :  { %3679 = vmatprep.subr.mxu1 %v4257_v2  ;;  %4020 = vmatprep.subr.bf16.mxu0 %v4019_v25 }
 0x892   :  { %3672 = vmatmul.mubr.msk.f32.vlgmr.msra.gmra.mrb[20].mxu1 %vm914_vm3, %v1434_v53  ;;  %4022 = vmatpush3.bf16.msra.mxu0 %v4019_v25 }
 0x893   :  { %3680 = vmatpush3.msra.mxu1 %v4626_v24  ;;  %3681 = vmatprep.mubr.msk.f32.mxu1 %vm4258_vm1, %v4257_v2  ;;  %v1942_v24 = vpop.permute.xlu0 %1941 }
 0x894   :  { %3689 = vmatprep.subr.mxu1 %v4257_v2 }
 0x896   :  { %3682 = vmatmul.mubr.msk.f32.vlgmr.msra.gmra.mrb[22].mxu1 %vm914_vm3, %v1604_v55 }
 0x897   :  { %3690 = vmatpush3.msra.mxu1 %v1771_v57  ;;  %3691 = vmatprep.mubr.msk.f32.mxu1 %vm4258_vm1, %v4257_v2  ;;  %v3205_v57 = vld [vmem:[%s5188_s1 + $0x1c0] sm:$0xff] }
 0x898   :  { %3699 = vmatprep.subr.mxu1 %v4257_v2 }
 0x89a   :  { %3692 = vmatmul.mubr.msk.f32.vlgmr.msra.gmra.mrb[24].mxu1 %vm914_vm3, %v1768_v58 }
 0x89b   :  { %3700 = vmatpush3.msra.mxu1 %v1942_v24  ;;  %3701 = vmatprep.mubr.msk.f32.mxu1 %vm4258_vm1, %v4257_v2  ;;  %v4039_v24 = vpack.c.bf16 %v3206_v59, %v3205_v57 }
 0x89c   :  { %3709 = vmatprep.subr.mxu1 %v4257_v2 }
 0x89d   :  { %4040 = vmatprep.subr.bf16.mxu0 %v4039_v24 }
 0x89e   :  { %3702 = vmatmul.mubr.msk.f32.vlgmr.msra.gmra.mrb[26].mxu1 %vm914_vm3, %v1940_v60  ;;  %v3197_v60 = vld [vmem:[%s5188_s1 + $0x190] sm:$0xff] }
 0x89f   :  { %3710 = vmatpush3.msra.mxu1 %v2113_v62  ;;  %3711 = vmatprep.mubr.msk.f32.mxu1 %vm4258_vm1, %v4257_v2  ;;  %v3207_v62 = vld [vmem:[%s5188_s1 + $0x1d0] sm:$0xff] }
 0x8a2   :  { %3712 = vmatmul.mubr.msk.f32.vlgmr.msra.gmra.mrb[28].mxu1 %vm914_vm3, %v2111_v63  ;;  %v4027_v63 = vpack.c.bf16 %v3198_v61, %v3197_v60 }
 0x95d   :  { %v1163_v5 = vpop.f32.mrb[16].mxu1 }
 0x95e   :  { %1168 = vrot.lane.b32.xlu0 %v1163_v5, %s4262_s18  ;;  %v3653_v6 = vpop.f32.mrb[17].mxu1  ;;  %v3208_v5 = vld [vmem:[%s5188_s1 + $0x1d8] sm:$0xff] }
 0x95f   :  { %v4043_v6 = vpack.c.bf16 %v3208_v5, %v3207_v62 }
 0x961   :  { %v1335_v10 = vpop.f32.mrb[18].mxu1 }
 0x962   :  { %1340 = vrot.lane.b32.xlu1 %v1335_v10, %s4263_s23  ;;  %v3663_v2 = vpop.f32.mrb[19].mxu1  ;;  %v4031_v10 = vpack.c.bf16 %v3200_v8, %v3199_v7  ;;  %v2327_v7 = vrot.slane %v4604_v4, %v4442_v36  ;;  %v4921_v8 = vld [vmem:[%s5187_s0 + $0x30] sm:$0xff] }
 0x963   :  { %v3210_v2 = vld [vmem:[%s5188_s1 + $0x1e8] sm:$0xff]  ;;  %vm2524_vm8 = vcmp.ge.f32.partialorder %v4921_v8, 1.0  ;;  %vm2541_vm12 = vcmp.ge.f32.partialorder %v4921_v8, 2.0  ;;  %vm2558_vm15 = vcmp.ge.f32.partialorder %v4921_v8, 3.0 }
 0x964   :  { %v4047_v11 = vpack.c.bf16 %v3210_v2, %v3209_v9  ;;  %v4926_v9 = vld [vmem:[%s5187_s0 + $0x38] sm:$0xff] }
 0x965   :  { %v1507_v14 = vpop.f32.mrb[20].mxu1  ;;  %vm2525_vm9 = vcmp.ge.f32.partialorder %v4926_v9, 1.0  ;;  %vm2542_vm13 = vcmp.ge.f32.partialorder %v4926_v9, 2.0  ;;  %vm2559_vm1 = vcmp.ge.f32.partialorder %v4926_v9, 3.0  ;;  %vm2610_vm3 = vcmp.ge.f32.partialorder %v4926_v9, 6.0 }
 0x966   :  { %1512 = vrot.lane.b32.xlu1 %v1507_v14, %s4264_s28  ;;  %v3673_v30 = vpop.f32.mrb[21].mxu1  ;;  %v3211_v14 = vld [vmem:[%s5188_s1 + $0x1f0] sm:$0xff] }
 0x967   :  { %v4035_v30 = vpack.c.bf16 %v3202_v13, %v3201_v12  ;;  %v4051_v17 = vpack.c.bf16 %v3212_v16, %v3211_v14 }
 0x969   :  { %v1674_v19 = vpop.f32.mrb[22].mxu1 }
 0x96a   :  { %1678 = vst.msk [vmem:[#allocation2 + $0x8] sm:$0xff] %vm836_vm2, %v1674_v19  ;;  %v3683_v22 = vpop.f32.mrb[23].mxu1  ;;  %vm2575_vm2 = vcmp.ge.f32.partialorder %v4921_v8, 4.0 }
 0x96d   :  { %v1842_v26 = vpop.f32.mrb[24].mxu1 }
 0x96e   :  { %1847 = vrot.lane.b32.xlu0 %v1842_v26, %s4262_s18  ;;  %v3693_v28 = vpop.f32.mrb[25].mxu1 }
 0x96f   :  { %v4872_v28 = vld [vmem:[%s5191_s4] sm:$0xff] }
 0x971   :  { %v2013_v31 = vpop.f32.mrb[26].mxu1 }
 0x972   :  { %2018 = vrot.lane.b32.xlu0 %v2013_v31, %s4263_s23  ;;  %v3703_v32 = vpop.f32.mrb[27].mxu1  ;;  %v2312_v31 = vrot.slane %v4872_v28, %v4635_v38 }
 0x975   :  { %v2184_v33 = vpop.f32.mrb[28].mxu1 }
 0x976   :  { %2189 = vrot.lane.b32.xlu1 %v2184_v33, %s4264_s28  ;;  %v3713_v34 = vpop.f32.mrb[29].mxu1 }
 0x9d0   :  { %v1169_v37 = vpop.permute.xlu0 %1168 }
 0x9d1   :  { %1172 = vst.msk [vmem:[#allocation2] sm:$0xff] %vm1171_vm4, %v1169_v37 }
 0x9d4   :  { %v1341_v39 = vpop.permute.xlu1 %1340 }
 0x9d5   :  { %1344 = vst.msk [vmem:[#allocation2] sm:$0xff] %vm1343_vm5, %v1341_v39 }
 0x9d8   :  { %v1513_v40 = vpop.permute.xlu1 %1512 }
 0x9d9   :  { %1516 = vst.msk [vmem:[#allocation2] sm:$0xff] %vm1515_vm6, %v1513_v40  ;;  %v3220_v40 = vld [vmem:[%s5188_s1 + $0x200] sm:$0xff] }
 0x9e0   :  { %v1848_v41 = vpop.permute.xlu0 %1847  ;;  %v2193_v42 = vld [vmem:[#allocation2] sm:$0xff] }
 0x9e1   :  { %1850 = vst.msk [vmem:[#allocation2 + $0x8] sm:$0xff] %vm1171_vm4, %v1848_v41  ;;  %3730 = vmatprep.mubr.msk.f32.mxu0 %vm5194_vm0, %v2193_v42  ;;  %v3221_v41 = vld [vmem:[%s5188_s1 + $0x208] sm:$0xff]  ;;  %v3222_v42 = vld [vmem:[%s5188_s1 + $0x210] sm:$0xff]  ;;  %vm2609_vm4 = vcmp.ge.f32.partialorder %v4921_v8, 6.0 }
 0x9e4   :  { %v2019_v35 = vpop.permute.xlu0 %2018 }
 0x9e5   :  { %2021 = vst.msk [vmem:[#allocation2 + $0x8] sm:$0xff] %vm1343_vm5, %v2019_v35  ;;  %v4055_v35 = vpack.c.bf16 %v3221_v41, %v3220_v40  ;;  %vm2592_vm5 = vcmp.ge.f32.partialorder %v4921_v8, 5.0 }
 0x9e8   :  { %v2190_v43 = vpop.permute.xlu1 %2189 }
 0x9e9   :  { %2192 = vst.msk [vmem:[#allocation2 + $0x8] sm:$0xff] %vm1515_vm6, %v2190_v43  ;;  %v3223_v43 = vld [vmem:[%s5188_s1 + $0x218] sm:$0xff]  ;;  %vm2593_vm6 = vcmp.ge.f32.partialorder %v4926_v9, 5.0 }
 0x9f0   :  { %v2194_v46 = vld [vmem:[#allocation2 + $0x8] sm:$0xff] }
 0x9f1   :  { %3731 = vmatmul.mubr.msk.f32.vlgmr.msra.gmra.mrb[18].mxu0 %vm5194_vm0, %v2194_v46  ;;  %v4059_v46 = vpack.c.bf16 %v3223_v43, %v3222_v42 }
 0x9f2   :  { %4042 = vmatpush3.bf16.msra.mxu0 %v4039_v24 }
 0x9f3   :  { %4044 = vmatprep.subr.bf16.mxu0 %v4043_v6 }
 0x9f6   :  { %4046 = vmatpush3.bf16.msra.mxu0 %v4043_v6  ;;  %v4914_v6 = vld [vmem:[%s5191_s4 + $0x10] sm:$0xff] }
 0x9f7   :  { %4048 = vmatprep.subr.bf16.mxu0 %v4047_v11  ;;  %v2531_v2 = vrot.slane %v4914_v6, %v4599_v3  ;;  %v2630_v8 = vrot.slane %v4914_v6, %v4352_v29 }
 0x9fa   :  { %4050 = vmatpush3.bf16.msra.mxu0 %v4047_v11  ;;  %v4940_v11 = vrot.slane %v4914_v6, %v4805_v47 }
 0x9fb   :  { %4052 = vmatprep.subr.bf16.mxu0 %v4051_v17 }
 0x9fe   :  { %4054 = vmatpush3.bf16.msra.mxu0 %v4051_v17 }
 0xac4   :  { %v3732_v51 = vpop.f32.mrb[18].mxu0 }
 0xac5   :  { %v2286_v49 = vadd.f32 %v3732_v51, %v4447_v44  ;;  %v2276_v1 = vpop.f32.mrb[19].mxu0  ;;  %v3195_v44 = vld [vmem:[%s5188_s1 + $0x180] sm:$0xff]  ;;  %v3225_v51 = vld [vmem:[%s5188_s1 + $0x228] sm:$0xff] }
 0xac6   :  { %v2285_v0 = vadd.f32 %v2276_v1, %v4450_v45  ;;  %v3196_v45 = vld [vmem:[%s5188_s1 + $0x188] sm:$0xff]  ;;  %v3226_v1 = vld [vmem:[%s5188_s1 + $0x230] sm:$0xff] }
 0xac7   :  { %v4811_v50 = vadd.f32 %v2290_v48, %v2286_v49  ;;  %v4023_v58 = vpack.c.bf16 %v3196_v45, %v3195_v44 }
 0xac8   :  { %v4813_v52 = vadd.f32 %v2290_v48, %v2285_v0  ;;  %v3224_v48 = vld [vmem:[%s5188_s1 + $0x220] sm:$0xff]  ;;  %v3227_v0 = vld [vmem:[%s5188_s1 + $0x238] sm:$0xff] }
 0xac9   :  { %v2294_v53 = vmul.f32 %v4811_v50, %v4811_v50  ;;  %4024 = vmatprep.subr.bf16.mxu1 %v4023_v58  ;;  %v4063_v49 = vpack.c.bf16 %v3225_v51, %v3224_v48 }
 0xaca   :  { %v2293_v54 = vmul.f32 %v4813_v52, %v4813_v52  ;;  %4026 = vmatpush3.bf16.msra.mxu1 %v4023_v58 }
 0xacb   :  { %v2298_v55 = vsel %vm5194_vm0, %v2294_v53, 0.0  ;;  %4028 = vmatprep.subr.bf16.mxu1 %v4027_v63  ;;  %v4067_v53 = vpack.c.bf16 %v3227_v0, %v3226_v1 }
 0xacc   :  { %2299 = vadd.xlane.f32.xlu1 %v2298_v55  ;;  %v2295_v56 = vsel %vm5194_vm0, %v2293_v54, 0.0  ;;  %v4907_v54 = vsub.s32 6, %v4349_v27 }
 0xacd   :  { %2296 = vadd.xlane.f32.xlu0 %v2295_v56 }
 0xace   :  { %4030 = vmatpush3.bf16.msra.mxu1 %v4027_v63  ;;  %v2421_v55 = vrot.slane %v4604_v4, %v4907_v54  ;;  %v4936_v4 = vrot.slane %v4914_v6, %v4614_v15  ;;  %v2548_v12 = vrot.slane %v4914_v6, %v4907_v54 }
 0xacf   :  { %4032 = vmatprep.subr.bf16.mxu1 %v4031_v10 }
 0xad2   :  { %4034 = vmatpush3.bf16.msra.mxu1 %v4031_v10  ;;  %v4930_v10 = vrot.slane %v4914_v6, %v4442_v36 }
 0xad3   :  { %4036 = vmatprep.subr.bf16.mxu1 %v4035_v30 }
 0xad6   :  { %4038 = vmatpush3.bf16.msra.mxu1 %v4035_v30  ;;  %v3217_v30 = vld [vmem:[%s5191_s4 + $0x18] ss:$0 sm:$0xff] }
 0xad7   :  { %4056 = vmatprep.subr.bf16.mxu1 %v4055_v35 }
 0xb59   :  { %v2300_v18 = vpop.xlane.xlu1 %2299 }
 0xb5a   :  { %v2302_v19 = vmul.f32 0.015625, %v2300_v18  ;;  %v2297_v20 = vpop.xlane.xlu0 %2296 }
 0xb5b   :  { %v2301_v21 = vmul.f32 0.015625, %v2297_v20 }
 0xb5c   :  { %v2304_v22 = vadd.f32 1e-05, %v2302_v19  ;;  %v4964_v19 = vrot.slane %v4914_v6, %v4635_v38 }
 0xb5d   :  { %v2303_v25 = vadd.f32 1e-05, %v2301_v21 }
 0xb5e   :  { %4194 = vrsqrt.f32 %v2304_v22 }
 0xb5f   :  { %4196 = vrsqrt.f32 %v2303_v25 }
 0xb68   :  { %v4195_v26 = vpop.eup %4194 }
 0xb69   :  { %v4197_v32 = vpop.eup %4196  ;;  %v2308_v33 = vmul.f32 %v4195_v26, %v4811_v50 }
 0xb6a   :  { %v2307_v34 = vmul.f32 %v4197_v32, %v4813_v52 }
 0xb6b   :  { %v2314_v39 = vmul.f32 %v2312_v31, %v2308_v33 }
 0xb6c   :  { %v2313_v37 = vmul.f32 %v2312_v31, %v2307_v34 }
 0xb6e   :  { %3749 = vmatprep.mubr.msk.f32.mxu1 %vm5194_vm0, %v2313_v37  ;;  %3768 = vmatprep.mubr.msk.f32.mxu0 %vm5194_vm0, %v2313_v37 }
 0xb6f   :  { %3750 = vmatmul.mubr.msk.f32.vlgmr.msra.gmra.mrb[30].mxu1 %vm5194_vm0, %v2314_v39  ;;  %3769 = vmatmul.mubr.msk.f32.vlgmr.msra.gmra.mrb[20].mxu0 %vm5194_vm0, %v2314_v39  ;;  %vm2606_vm0 = vcmp.lt.s32.totalorder %v4349_v27, 6 }
 0xb70   :  { %4058 = vmatpush3.bf16.msra.mxu1 %v4055_v35 }
 0xb71   :  { %4060 = vmatprep.subr.bf16.mxu1 %v4059_v46 }
 0xb74   :  { %4062 = vmatpush3.bf16.msra.mxu1 %v4059_v46 }
 0xb75   :  { %4064 = vmatprep.subr.bf16.mxu1 %v4063_v49 }
 0xb78   :  { %4066 = vmatpush3.bf16.msra.mxu1 %v4063_v49 }
 0xb79   :  { %4068 = vmatprep.subr.bf16.mxu1 %v4067_v53 }
 0xb7c   :  { %4070 = vmatpush3.bf16.msra.mxu1 %v4067_v53 }
 0xc42   :  { %v3751_v56 = vpop.f32.mrb[30].mxu1  ;;  %v3770_v44 = vpop.f32.mrb[20].mxu0 }
 0xc43   :  { %v2494_v45 = vadd.f32 %v3770_v44, %v2421_v55  ;;  %v2400_v57 = vpop.f32.mrb[31].mxu1  ;;  %v2488_v58 = vpop.f32.mrb[21].mxu0  ;;  %v2406_v36 = vadd.f32 %v3751_v56, %v2327_v7 }
 0xc44   :  { %v2489_v59 = vadd.f32 %v2488_v58, %v2421_v55  ;;  %v2401_v14 = vadd.f32 %v2400_v57, %v2327_v7 }
 0xc45   :  { %v3216_v24 = vmul.f32 -1.442695, %v2494_v45 }
 0xc46   :  { %v3215_v60 = vmul.f32 -1.442695, %v2489_v59 }
 0xc47   :  { %4198 = vpow2.f32 %v3216_v24 }
 0xc48   :  { %4200 = vpow2.f32 %v3215_v60 }
 0xc51   :  { %v4199_v61 = vpop.eup %4198 }
 0xc52   :  { %v4201_v62 = vpop.eup %4200  ;;  %v2504_v63 = vadd.f32 1.0, %v4199_v61 }
 0xc53   :  { %v2503_v5 = vadd.f32 1.0, %v4201_v62 }
 0xc54   :  { %4202 = vrcp.f32 %v2504_v63 }
 0xc55   :  { %4204 = vrcp.f32 %v2503_v5 }
 0xc5e   :  { %v4203_v13 = vpop.eup %4202 }
 0xc5f   :  { %v4205_v16 = vpop.eup %4204  ;;  %v4955_v17 = vmul.f32 %v4203_v13, %v2406_v36 }
 0xc60   :  { %v2509_v18 = vmul.f32 %v4205_v16, %v2401_v14 }
 0xc61   :  { %v2516_v20 = vmul.f32 %v3217_v30, %v4955_v17  ;;  %v2518_v21 = vrot.slane %v4955_v17, 7  ;;  %v2537_v22 = vrot.slane %v4955_v17, 6  ;;  %v2554_v25 = vrot.slane %v4955_v17, 5 }
 0xc62   :  { %v2515_v26 = vmul.f32 %v3217_v30, %v2509_v18  ;;  %v2517_v31 = vrot.slane %v2509_v18, 7  ;;  %v2536_v32 = vrot.slane %v2509_v18, 6  ;;  %v2553_v33 = vrot.slane %v2509_v18, 5 }
 0xc63   :  { %v2570_v34 = vrot.slane %v2509_v18, 4  ;;  %v2571_v37 = vrot.slane %v4955_v17, 4  ;;  %v2587_v39 = vrot.slane %v2509_v18, 3  ;;  %v2588_v40 = vrot.slane %v4955_v17, 3 }
 0xc64   :  { %v2522_v41 = vsel %vm2521_vm7, %v2517_v31, %v2518_v21  ;;  %v2523_v42 = vsel %vm2521_vm7, %v2518_v21, %v2517_v31  ;;  %v2539_v35 = vsel %vm2538_vm10, %v2536_v32, %v2537_v22  ;;  %v2540_v43 = vsel %vm2538_vm10, %v2537_v22, %v2536_v32 }
 0xc65   :  { %v2526_v46 = vsel %vm2524_vm8, %v2523_v42, 0.0  ;;  %v2527_v48 = vsel %vm2525_vm9, %v2522_v41, 0.0  ;;  %v2543_v51 = vsel %vm2541_vm12, %v2540_v43, 0.0  ;;  %v2544_v49 = vsel %vm2542_vm13, %v2539_v35, 0.0 }
 0xc66   :  { %v2532_v1 = vmul.f32 %v2531_v2, %v2526_v46  ;;  %v2533_v0 = vmul.f32 %v2531_v2, %v2527_v48  ;;  %v2549_v53 = vmul.f32 %v2548_v12, %v2543_v51  ;;  %v2550_v55 = vmul.f32 %v2548_v12, %v2544_v49 }
 0xc67   :  { %v2556_v56 = vsel %vm2555_vm11, %v2553_v33, %v2554_v25  ;;  %v2557_v44 = vsel %vm2555_vm11, %v2554_v25, %v2553_v33  ;;  %v2573_v45 = vsel %vm2572_vm14, %v2570_v34, %v2571_v37  ;;  %v2574_v57 = vsel %vm2572_vm14, %v2571_v37, %v2570_v34  ;;  %v4231_v34 = vld [vmem:[%s5191_s4 + $0x8] sm:$0xff] }
 0xc68   :  { %v2534_v58 = vadd.f32 %v2532_v1, %v2515_v26  ;;  %v2535_v59 = vadd.f32 %v2533_v0, %v2516_v20  ;;  %v2560_v24 = vsel %vm2558_vm15, %v2557_v44, 0.0  ;;  %v2561_v60 = vsel %vm2559_vm1, %v2556_v56, 0.0 }
 0xc69   :  { %v2566_v61 = vmul.f32 %v4930_v10, %v2560_v24  ;;  %v2567_v62 = vmul.f32 %v4930_v10, %v2561_v60  ;;  %v2577_v63 = vsel %vm2575_vm2, %v2574_v57, 0.0  ;;  %vm5195_vm7 = vcmp.ge.f32.partialorder %v4926_v9, 4.0 }
 0xc6a   :  { %v2578_v5 = vsel %vm5195_vm7, %v2573_v45, 0.0  ;;  %v2551_v7 = vadd.f32 %v2549_v53, %v2534_v58  ;;  %v2552_v2 = vadd.f32 %v2550_v55, %v2535_v59  ;;  %v2583_v12 = vmul.f32 %v4940_v11, %v2577_v63 }
 0xc6b   :  { %v2584_v36 = vmul.f32 %v4940_v11, %v2578_v5  ;;  %vm5196_vm8 = vcmp.lt.s32.totalorder %v4349_v27, 5  ;;  %v2604_v30 = vrot.slane %v2509_v18, 2  ;;  %v2605_v10 = vrot.slane %v4955_v17, 2  ;;  %v3239_v5 = vld [vmem:[%s5189_s2 + $0xc8] sm:$0xff] }
 0xc6c   :  { %v2590_v13 = vsel %vm5196_vm8, %v2587_v39, %v2588_v40  ;;  %vm5197_vm9 = vmmov %vm5196_vm8  ;;  %v2568_v16 = vadd.f32 %v2566_v61, %v2551_v7  ;;  %v2569_v20 = vadd.f32 %v2567_v62, %v2552_v2  ;;  %v2742_v44 = vrot.slane %v4914_v6, %v4438_v23  ;;  %v3238_v6 = vld [vmem:[%s5189_s2 + $0xc0] sm:$0xff]  ;;  %v3232_v2 = vld [vmem:[%s5189_s2 + $0x90] sm:$0xff] }
 0xc6d   :  { %v2591_v14 = vsel %vm5197_vm9, %v2588_v40, %v2587_v39  ;;  %v2595_v22 = vsel %vm2593_vm6, %v2590_v13, 0.0  ;;  %v2607_v26 = vsel %vm2606_vm0, %v2604_v30, %v2605_v10  ;;  %v2608_v18 = vsel %vm2606_vm0, %v2605_v10, %v2604_v30  ;;  %v3234_v30 = vld [vmem:[%s5189_s2 + $0xa0] sm:$0xff]  ;;  %v3235_v10 = vld [vmem:[%s5189_s2 + $0xa8] sm:$0xff] }
 0xc6e   :  { %v2594_v21 = vsel %vm2592_vm5, %v2591_v14, 0.0  ;;  %v2601_v11 = vmul.f32 %v4936_v4, %v2595_v22  ;;  %v2585_v31 = vadd.f32 %v2583_v12, %v2568_v16  ;;  %v2586_v17 = vadd.f32 %v2584_v36, %v2569_v20  ;;  %v3233_v12 = vld [vmem:[%s5189_s2 + $0x98] sm:$0xff]  ;;  %v3240_v36 = vld [vmem:[%s5189_s2 + $0xd0] sm:$0xff]  ;;  %v3243_v22 = vld [vmem:[%s5189_s2 + $0xe8] sm:$0xff] }
 0xc6f   :  { %v2600_v25 = vmul.f32 %v4936_v4, %v2594_v21  ;;  %v2611_v32 = vsel %vm2609_vm4, %v2608_v18, 0.0  ;;  %v2612_v33 = vsel %vm2610_vm3, %v2607_v26, 0.0  ;;  %v2624_v4 = vrot.slane %v4231_v34, %v4599_v3  ;;  %v3241_v14 = vld [vmem:[%s5189_s2 + $0xd8] sm:$0xff]  ;;  %v3242_v21 = vld [vmem:[%s5189_s2 + $0xe0] sm:$0xff]  ;;  %v3244_v18 = vld [vmem:[%s5189_s2 + $0xf0] sm:$0xff] }
 0xc70   :  { %v2603_v39 = vadd.f32 %v2601_v11, %v2586_v17  ;;  %v2617_v40 = vmul.f32 %v4964_v19, %v2611_v32  ;;  %v2618_v27 = vmul.f32 %v4964_v19, %v2612_v33  ;;  %vm5198_vm0 = vcmask 523264   ;;  %v3237_v26 = vld [vmem:[%s5189_s2 + $0xb8] sm:$0xff] }
 0xc71   :  { %v2602_v37 = vadd.f32 %v2600_v25, %v2585_v31  ;;  %vm5199_vm10 = vmmov %vm5198_vm0  ;;  %v4087_v7 = vpack.c.bf16 %v3239_v5, %v3238_v6  ;;  %v4075_v13 = vpack.c.bf16 %v3233_v12, %v3232_v2  ;;  %v4091_v16 = vpack.c.bf16 %v3241_v14, %v3240_v36  ;;  %v3236_v25 = vld [vmem:[%s5189_s2 + $0xb0] sm:$0xff]  ;;  %v3245_v31 = vld [vmem:[%s5189_s2 + $0xf8] sm:$0xff] }
 0xc72   :  { %v2620_v42 = vadd.f32 %v2618_v27, %v2603_v39  ;;  %vm5200_vm11 = vmmov %vm5198_vm0  ;;  %v4079_v20 = vpack.c.bf16 %v3235_v10, %v3234_v30  ;;  %v4095_v11 = vpack.c.bf16 %v3243_v22, %v3242_v21  ;;  %v4083_v17 = vpack.c.bf16 %v3237_v26, %v3236_v25  ;;  %v3261_v6 = vld [vmem:[%s5190_s3 + $0xf8] sm:$0xff]  ;;  %v4232_v5 = vld [vmem:[%s5192_s5] sm:$0xf] }
 0xc73   :  { %v2619_v41 = vadd.f32 %v2617_v40, %v2602_v37  ;;  %vm5201_vm12 = vmmov %vm5198_vm0  ;;  %4088 = vmatprep.subr.bf16.mxu1 %v4087_v7  ;;  %v4099_v32 = vpack.c.bf16 %v3245_v31, %v3244_v18  ;;  %v2799_v27 = vrot.slane %v4872_v28, %v4614_v15 }
 0xc74   :  { %v2626_v9 = vmul.f32 %v2624_v4, %v2620_v42  ;;  %vm5202_vm13 = vmmov %vm5198_vm0 }
 0xc75   :  { %v2625_v35 = vmul.f32 %v2624_v4, %v2619_v41  ;;  %vm5203_vm14 = vmmov %vm5198_vm0 }
 0xc76   :  { %v2632_v46 = vadd.f32 %v2630_v8, %v2626_v9  ;;  %vm5204_vm15 = vmmov %vm5198_vm0 }
 0xc77   :  { %v2631_v43 = vadd.f32 %v2630_v8, %v2625_v35  ;;  %vm5205_vm1 = vmmov %vm5198_vm0 }
 0xc78   :  { %v3219_v51 = vmul.f32 -1.442695, %v2632_v46  ;;  %vm5206_vm2 = vmmov %vm5198_vm0 }
 0xc79   :  { %v3218_v48 = vmul.f32 -1.442695, %v2631_v43  ;;  %vm5207_vm3 = vmmov %vm5198_vm0 }
 0xc7a   :  { %vm5208_vm4 = vmmov %vm5198_vm0 }
 0xc7b   :  { %4206 = vpow2.f32 %v3218_v48  ;;  %v3247_v48 = vld [vmem:[%s5190_s3 + $0x88] sm:$0xff]  ;;  %vm5209_vm5 = vmmov %vm5198_vm0 }
 0xc7c   :  { %4208 = vpow2.f32 %v3219_v51 }
 0xc85   :  { %v4207_v3 = vpop.eup %4206 }
 0xc86   :  { %v4209_v49 = vpop.eup %4208  ;;  %v2639_v1 = vadd.f32 1.0, %v4207_v3  ;;  %v3248_v3 = vld [vmem:[%s5190_s3 + $0x90] sm:$0xff] }
 0xc87   :  { %v2640_v0 = vadd.f32 1.0, %v4209_v49  ;;  %v3249_v49 = vld [vmem:[%s5190_s3 + $0x98] sm:$0xff] }
 0xc88   :  { %4210 = vrcp.f32 %v2639_v1  ;;  %v4107_v1 = vpack.c.bf16 %v3249_v49, %v3248_v3 }
 0xc89   :  { %4212 = vrcp.f32 %v2640_v0  ;;  %v3250_v0 = vld [vmem:[%s5190_s3 + $0xa0] sm:$0xff] }
 0xc92   :  { %v4211_v19 = vpop.eup %4210 }
 0xc93   :  { %v4213_v53 = vpop.eup %4212  ;;  %v2645_v55 = vmul.f32 %v4211_v19, %v2631_v43  ;;  %v3251_v19 = vld [vmem:[%s5190_s3 + $0xa8] sm:$0xff] }
 0xc94   :  { %v2646_v56 = vmul.f32 %v4213_v53, %v2632_v46  ;;  %v3246_v46 = vld [vmem:[%s5190_s3 + $0x80] sm:$0xff]  ;;  %v4111_v53 = vpack.c.bf16 %v3251_v19, %v3250_v0 }
 0xc95   :  { %3787 = vmatprep.mubr.msk.f32.mxu1 %vm5198_vm0, %v2645_v55  ;;  %v4103_v51 = vpack.c.bf16 %v3247_v48, %v3246_v46  ;;  %v3252_v55 = vld [vmem:[%s5190_s3 + $0xb0] sm:$0xff] }
 0xc96   :  { %3788 = vmatmul.mubr.msk.f32.vlgmr.msra.gmra.mrb[32].mxu1 %vm5199_vm10, %v2646_v56  ;;  %v3253_v56 = vld [vmem:[%s5190_s3 + $0xb8] sm:$0xff] }
 0xc97   :  { %4090 = vmatpush3.bf16.msra.mxu1 %v4087_v7  ;;  %v2805_v7 = vrot.slane %v4232_v5, %v4635_v38 }
 0xc98   :  { %4092 = vmatprep.subr.bf16.mxu1 %v4091_v16 }
 0xc9b   :  { %4094 = vmatpush3.bf16.msra.mxu1 %v4091_v16 }
 0xc9c   :  { %4096 = vmatprep.subr.bf16.mxu1 %v4095_v11 }
 0xc9f   :  { %4098 = vmatpush3.bf16.msra.mxu1 %v4095_v11  ;;  %v2904_v11 = vrot.slane %v4232_v5, %v4614_v15 }
 0xca0   :  { %4100 = vmatprep.subr.bf16.mxu1 %v4099_v32 }
 0xca3   :  { %4102 = vmatpush3.bf16.msra.mxu1 %v4099_v32 }
 0xd69   :  { %v3789_v29 = vpop.f32.mrb[32].mxu1 }
 0xd6a   :  { %v2738_v45 = vadd.f32 %v3789_v29, %v4811_v50  ;;  %v2728_v57 = vpop.f32.mrb[33].mxu1  ;;  %v3230_v50 = vld [vmem:[%s5189_s2 + $0x80] sm:$0xff]  ;;  %v4115_v29 = vpack.c.bf16 %v3253_v56, %v3252_v55 }
 0xd6b   :  { %v2737_v58 = vadd.f32 %v2728_v57, %v4813_v52  ;;  %v3231_v52 = vld [vmem:[%s5189_s2 + $0x88] sm:$0xff] }
 0xd6c   :  { %v5046_v59 = vadd.f32 %v2742_v44, %v2738_v45  ;;  %v4071_v63 = vpack.c.bf16 %v3231_v52, %v3230_v50  ;;  %v3255_v45 = vld [vmem:[%s5190_s3 + $0xc8] sm:$0xff]  ;;  %v3260_v50 = vld [vmem:[%s5190_s3 + $0xf0] sm:$0xff] }
 0xd6d   :  { %v5048_v24 = vadd.f32 %v2742_v44, %v2737_v58  ;;  %v3254_v44 = vld [vmem:[%s5190_s3 + $0xc0] sm:$0xff]  ;;  %v3256_v58 = vld [vmem:[%s5190_s3 + $0xd0] sm:$0xff] }
 0xd6e   :  { %v2781_v62 = vmul.f32 %v5046_v59, %v5046_v59  ;;  %4072 = vmatprep.subr.bf16.mxu0 %v4071_v63  ;;  %v4119_v57 = vpack.c.bf16 %v3255_v45, %v3254_v44 }
 0xd6f   :  { %v2780_v60 = vmul.f32 %v5048_v24, %v5048_v24  ;;  %4074 = vmatpush3.bf16.msra.mxu0 %v4071_v63  ;;  %v4131_v63 = vpack.c.bf16 %v3261_v6, %v3260_v50 }
 0xd70   :  { %v2785_v23 = vsel %vm5201_vm12, %v2781_v62, 0.0  ;;  %4076 = vmatprep.subr.bf16.mxu0 %v4075_v13  ;;  %v3258_v62 = vld [vmem:[%s5190_s3 + $0xe0] sm:$0xff] }
 0xd71   :  { %v2782_v61 = vsel %vm5200_vm11, %v2780_v60, 0.0  ;;  %v3257_v60 = vld [vmem:[%s5190_s3 + $0xd8] sm:$0xff] }
 0xd72   :  { %2783 = vadd.xlane.f32.xlu0 %v2782_v61  ;;  %v4123_v61 = vpack.c.bf16 %v3257_v60, %v3256_v58 }
 0xd73   :  { %4078 = vmatpush3.bf16.msra.mxu0 %v4075_v13 }
 0xd74   :  { %4080 = vmatprep.subr.bf16.mxu0 %v4079_v20 }
 0xd76   :  { %2786 = vadd.xlane.f32.xlu0 %v2785_v23  ;;  %v3259_v23 = vld [vmem:[%s5190_s3 + $0xe8] sm:$0xff]  ;;  %s4265_s3 = smov [#allocation3]  }
 0xd77   :  { %4082 = vmatpush3.bf16.msra.mxu0 %v4079_v20  ;;  %v4127_v52 = vpack.c.bf16 %v3259_v23, %v3258_v62  ;;  %s3094_s5 = sshll.u32 %s4265_s3, 4  ;;  %s3095_s5 = int_to_ptr.vmem [resolvable:$true] %s3094_s5 }
 0xd78   :  { %4084 = vmatprep.subr.bf16.mxu0 %v4083_v17  ;;  %s4233_s8 = scalar_lea.vmem %s3095_s5, 256  ;;  %p4238_p1 = scmp.lt.s32.totalorder %s3095_s5, %s3095_s5 }
 0xd79   :  { %p4234_p0 = scmp.ne.s32.totalorder %s3095_s5, %s4233_s8  ;;  %p4239_p2 = scmp.lt.s32.totalorder %s4233_s8, %s4233_s8 }
 0xd7b   :  { %4086 = vmatpush3.bf16.msra.mxu0 %v4083_v17  ;;  %p4240_p3 = por %p4239_p2, %p4238_p1 }
 0xd7c   :  { %4104 = vmatprep.subr.bf16.mxu0 %v4103_v51 }
 0xd7d   :  { %p4241_p4 = pnand %p4240_p3, %p4234_p0 }
 0xdff   :  { %v2784_v33 = vpop.xlane.xlu0 %2783 }
 0xe00   :  { %v2788_v34 = vmul.f32 0.015625, %v2784_v33 }
 0xe02   :  { %v2790_v4 = vadd.f32 1e-05, %v2788_v34 }
 0xe03   :  { %v2787_v37 = vpop.xlane.xlu0 %2786 }
 0xe04   :  { %4214 = vrsqrt.f32 %v2790_v4  ;;  %v2789_v39 = vmul.f32 0.015625, %v2787_v37  ;;  %v2985_v4 = vrot.slane %v4872_v28, %v4907_v54 }
 0xe06   :  { %v2791_v40 = vadd.f32 1e-05, %v2789_v39 }
 0xe08   :  { %4216 = vrsqrt.f32 %v2791_v40 }
 0xe0e   :  { %v4215_v41 = vpop.eup %4214 }
 0xe0f   :  { %v2794_v42 = vmul.f32 %v4215_v41, %v5048_v24 }
 0xe11   :  { %v2800_v8 = vmul.f32 %v2799_v27, %v2794_v42 }
 0xe12   :  { %v4217_v35 = vpop.eup %4216 }
 0xe13   :  { %v2795_v9 = vmul.f32 %v4217_v35, %v5046_v59  ;;  %3806 = vmatprep.mubr.msk.f32.mxu0 %vm5202_vm13, %v2800_v8  ;;  %3825 = vmatprep.mubr.msk.f32.mxu1 %vm5203_vm14, %v2800_v8 }
 0xe15   :  { %v2801_v43 = vmul.f32 %v2799_v27, %v2795_v9 }
 0xe17   :  { %3807 = vmatmul.mubr.msk.f32.vlgmr.msra.gmra.mrb[22].mxu0 %vm5204_vm15, %v2801_v43  ;;  %3826 = vmatmul.mubr.msk.f32.vlgmr.msra.gmra.mrb[34].mxu1 %vm5205_vm1, %v2801_v43 }
 0xe18   :  { %4106 = vmatpush3.bf16.msra.mxu0 %v4103_v51 }
 0xe19   :  { %4108 = vmatprep.subr.bf16.mxu0 %v4107_v1 }
 0xe1c   :  { %4110 = vmatpush3.bf16.msra.mxu0 %v4107_v1 }
 0xe1d   :  { %4112 = vmatprep.subr.bf16.mxu0 %v4111_v53 }
 0xe20   :  { %4114 = vmatpush3.bf16.msra.mxu0 %v4111_v53 }
 0xe21   :  { %4116 = vmatprep.subr.bf16.mxu0 %v4115_v29 }
 0xe24   :  { %4118 = vmatpush3.bf16.msra.mxu0 %v4115_v29 }
 0xe25   :  { %4120 = vmatprep.subr.bf16.mxu0 %v4119_v57 }
 0xe28   :  { %4122 = vmatpush3.bf16.msra.mxu0 %v4119_v57 }
 0xe29   :  { %4124 = vmatprep.subr.bf16.mxu0 %v4123_v61 }
 0xe2c   :  { %4126 = vmatpush3.bf16.msra.mxu0 %v4123_v61 }
 0xe2d   :  { %4128 = vmatprep.subr.bf16.mxu0 %v4127_v52 }
 0xe30   :  { %4130 = vmatpush3.bf16.msra.mxu0 %v4127_v52 }
 0xe31   :  { %4132 = vmatprep.subr.bf16.mxu0 %v4131_v63 }
 0xe34   :  { %4134 = vmatpush3.bf16.msra.mxu0 %v4131_v63 }
 0xeea   :  { %v3808_v2 = vpop.f32.mrb[22].mxu0  ;;  %v3827_v12 = vpop.f32.mrb[34].mxu1 }
 0xeeb   :  { %v2884_v36 = vadd.f32 %v3808_v2, %v2805_v7  ;;  %v2878_v13 = vpop.f32.mrb[23].mxu0  ;;  %v2971_v14 = vpop.f32.mrb[35].mxu1  ;;  %v2977_v31 = vadd.f32 %v3827_v12, %v2904_v11 }
 0xeec   :  { %v2879_v30 = vadd.f32 %v2878_v13, %v2805_v7  ;;  %v2972_v32 = vadd.f32 %v2971_v14, %v2904_v11 }
 0xeed   :  { %v3265_v10 = vmul.f32 -1.442695, %v2884_v36 }
 0xeee   :  { %v3264_v16 = vmul.f32 -1.442695, %v2879_v30 }
 0xeef   :  { %4218 = vpow2.f32 %v3265_v10 }
 0xef0   :  { %4220 = vpow2.f32 %v3264_v16 }
 0xef9   :  { %v4219_v20 = vpop.eup %4218 }
 0xefa   :  { %v4221_v21 = vpop.eup %4220  ;;  %v2894_v22 = vadd.f32 1.0, %v4219_v20 }
 0xefb   :  { %v2893_v25 = vadd.f32 1.0, %v4221_v21 }
 0xefc   :  { %4222 = vrcp.f32 %v2894_v22 }
 0xefd   :  { %4224 = vrcp.f32 %v2893_v25 }
 0xf06   :  { %v4223_v26 = vpop.eup %4222 }
 0xf07   :  { %v4225_v38 = vpop.eup %4224  ;;  %v2900_v18 = vmul.f32 %v4223_v26, %v2884_v36 }
 0xf08   :  { %v2899_v17 = vmul.f32 %v4225_v38, %v2879_v30 }
 0xf09   :  { %v2981_v33 = vmul.f32 %v2977_v31, %v2900_v18 }
 0xf0a   :  { %v2980_v34 = vmul.f32 %v2972_v32, %v2899_v17 }
 0xf0c   :  { %3860 = vmatprep.mubr.f32.mxu0 %v2980_v34 }
 0xf0d   :  { %3861 = vmatmul.mubr.f32.vlgmr.msra.gmra.mrb[24].mxu0 %v2981_v33 }
 0xfe0   :  { %v3862_v37 = vpop.f32.mrb[24].mxu0 }
 0xfe1   :  { %v3058_v39 = vadd.f32 %v3862_v37, %v2985_v4  ;;  %v3052_v40 = vpop.f32.mrb[25].mxu0 }
 0xfe2   :  { %v3053_v27 = vadd.f32 %v3052_v40, %v2985_v4 }
 0xfe3   :  { %v3062_v41 = vmul.f32 0.5, %v3058_v39 }
 0xfe4   :  { %v3061_v42 = vmul.f32 0.5, %v3053_v27 }
 0xfe5   :  { %v3064_v15 = vadd.f32 %v3062_v41, %v5046_v59  ;;  %v3084_v59 = vrot.slane %v4872_v28, %v4805_v47 }
 0xfe6   :  { %v3063_v8 = vadd.f32 %v3061_v42, %v5048_v24 }
 0xfe7   :  { %v3066_v35 = vmul.f32 %v3064_v15, %v3064_v15 }
 0xfe8   :  { %v3065_v9 = vmul.f32 %v3063_v8, %v3063_v8 }
 0xfe9   :  { %v3070_v43 = vsel %vm5206_vm2, %v3066_v35, 0.0 }
 0xfea   :  { %3071 = vadd.xlane.f32.xlu1 %v3070_v43  ;;  %v3067_v46 = vsel %vm5207_vm3, %v3065_v9, 0.0 }
 0xfeb   :  { %3068 = vadd.xlane.f32.xlu0 %v3067_v46 }
0x1077   :  { %v3072_v48 = vpop.xlane.xlu1 %3071 }
0x1078   :  { %v3074_v54 = vmul.f32 0.015625, %v3072_v48  ;;  %v3069_v51 = vpop.xlane.xlu0 %3068 }
0x1079   :  { %v3073_v3 = vmul.f32 0.015625, %v3069_v51 }
0x107a   :  { %v3076_v49 = vadd.f32 1e-05, %v3074_v54 }
0x107b   :  { %v3075_v1 = vadd.f32 1e-05, %v3073_v3 }
0x107c   :  { %4226 = vrsqrt.f32 %v3076_v49 }
0x107d   :  { %4228 = vrsqrt.f32 %v3075_v1 }
0x1086   :  { %v4227_v24 = vpop.eup %4226 }
0x1087   :  { %v4229_v0 = vpop.eup %4228  ;;  %v3080_v19 = vmul.f32 %v4227_v24, %v3064_v15 }
0x1088   :  { %v3079_v53 = vmul.f32 %v4229_v0, %v3063_v8 }
0x1089   :  { %v3086_v55 = vmul.f32 %v3084_v59, %v3080_v19 }
0x108a   :  { %v3085_v56 = vmul.f32 %v3084_v59, %v3079_v53 }
0x108b   :  { %3088 = vst.msk [vmem:[#allocation3 + $0x8] sm:$0xff] %vm5208_vm4, %v3086_v55 }
0x108c   :  { %3087 = vst.msk [vmem:[#allocation3] sm:$0xff] %vm5209_vm5, %v3085_v56 }
0x108d   :  { %4244 = shalt.err (!%p4241_p4)
}
0x108e   :  { %s4245_s11 = scalar_lea.hbm %s5193_s6, 256 }
0x108f   :  { %p4246_p5 = scmp.ne.s32.totalorder %s5193_s6, %s4245_s11  ;;  %p4249_p6 = scmp.lt.u32.totalorder %s4245_s11, %s5193_s6 }
0x1091   :  { %p4251_p7 = pnand %p4249_p6, %p4246_p5 }
0x1093   :  { %4254 = shalt.err (!%p4251_p7)
}
0x1094   :  { %s4266_s15 = smov 128   ;;  %s4267_s16 = smov 8  }
0x1095   :  { %3100 = dma.vmem_to_hbm [thread:$0]  %s3095_s5, 256, %s5193_s6, [#allocation4], %s4266_s15, %s4266_s15, %s4267_s16  }
0x1096   :  { %4255 = dma.done.wait [#allocation4], 256  }
0x1097   :  { %4256 = vsyncadd [#allocation4], 4294967040 }
0x1098   :  { %3104 = vsyncpa [#allocation4], 1 }

</bundles_post_ra>
